<compile_context>
chip_gen: v5e
topology: v5e:2x2
jax: 0.10.0
libtpu: 0.0.40
codegen_flags: <defaults>
</compile_context>

<pallas_src>
import functools

import jax
import jax.numpy as jnp
from jax.experimental import pallas as pl
from jax.experimental.pallas import tpu as pltpu


# --------------------------- model config ----------------------------------

VOCAB = 64
VOCAB_PAD = 128          # lane-dense decoder output (multiple of 128)
HIDDEN = 32
N_HEADS = 4
HEAD_DIM = HIDDEN // N_HEADS
FFN = 64
N_LAYERS = 2
MAX_POS = 16
TYPE_VOCAB = 2
NEG_INF = -1e9


# --------------------------- in-kernel helpers ------------------------------

def _ln(x, g, b, eps=1e-12):
    mu = jnp.mean(x, axis=-1, keepdims=True)
    var = jnp.mean((x - mu) ** 2, axis=-1, keepdims=True)
    return (x - mu) * jax.lax.rsqrt(var + eps) * g + b


def _gelu(x):
    # TODO(synk): HF BERT default 'gelu' is the exact erf form; tanh approx used.
    return 0.5 * x * (1.0 + jnp.tanh(0.7978845608028654 *
                                     (x + 0.044715 * x * x * x)))


# --------------------------- fused kernel -----------------------------------

def _bert_fused_kernel(
    # inputs
    emb_ref, mask_ref, emb_ln_g_ref, emb_ln_b_ref,
    wqkv_ref, bqkv_ref, wo_ref, bo_ref, ln1_g_ref, ln1_b_ref,
    w1_ref, b1_ref, w2_ref, b2_ref, ln2_g_ref, ln2_b_ref,
    mlm_w_ref, mlm_b_ref, mlm_ln_g_ref, mlm_ln_b_ref,
    dec_w_ref, dec_b_ref,
    # output
    out_ref,
    # scratch
    x_ref,
    *, batch, seq):
    layer = pl.program_id(0)
    bs = batch * seq                       # token rows, (seq, batch)-major

    # Embedding LayerNorm, once before layer 0. Hidden state lives in x_ref
    # (VMEM scratch) across all grid iterations (layers).
    @pl.when(layer == 0)
    def _():
        x_ref[...] = _ln(emb_ref[...], emb_ln_g_ref[...], emb_ln_b_ref[...])

    x = x_ref[...]                                       # (bs, H) fp32

    # --- fused QKV projection: one MXU pass, scale folded into wq/bq ---
    qkv = jnp.dot(x.astype(jnp.bfloat16), wqkv_ref[...],
                  preferred_element_type=jnp.float32) + bqkv_ref[...]  # (bs, 3H)

    # --- one block-diagonal attention over ALL (head, batch) pairs ---
    # Stack heads along sublanes: row index = h*bs + token_row. The additive
    # mask (precomputed in the wrapper) keeps only same-head/same-batch,
    # non-padded key columns, so a single softmax handles everything.
    def stack_heads(col0):
        return jnp.concatenate(
            [qkv[:, col0 + h * HEAD_DIM: col0 + (h + 1) * HEAD_DIM]
             for h in range(N_HEADS)], axis=0).astype(jnp.bfloat16)  # (NH*bs, Dh)

    q_r = stack_heads(0)
    k_r = stack_heads(HIDDEN)
    v_r = stack_heads(2 * HIDDEN)

    scores = jax.lax.dot_general(                        # (NH*bs, NH*bs) f32
        q_r, k_r, (((1,), (1,)), ((), ())),
        preferred_element_type=jnp.float32) + mask_ref[...]
    mx = jnp.max(scores, axis=-1, keepdims=True)
    p = jnp.exp(scores - mx)
    denom = jnp.sum(p, axis=-1, keepdims=True)
    probs = (p * pl.reciprocal(denom, approx=True)).astype(jnp.bfloat16)
    ctx = jnp.dot(probs, v_r, preferred_element_type=jnp.float32)    # (NH*bs, Dh)
    ctx = ctx.astype(jnp.bfloat16)

    # --- attention output projection (per-head Wo, no lane re-merge) ---
    attn = bo_ref[...]
    for h in range(N_HEADS):
        attn = attn + jnp.dot(ctx[h * bs:(h + 1) * bs, :], wo_ref[h],
                              preferred_element_type=jnp.float32)
    x = _ln(attn + x, ln1_g_ref[...], ln1_b_ref[...])

    # --- GELU feed-forward + residual + LN ---
    h1 = _gelu(jnp.dot(x.astype(jnp.bfloat16), w1_ref[...],
                       preferred_element_type=jnp.float32) + b1_ref[...])
    h2 = jnp.dot(h1.astype(jnp.bfloat16), w2_ref[...],
                 preferred_element_type=jnp.float32) + b2_ref[...]
    x = _ln(h2 + x, ln2_g_ref[...], ln2_b_ref[...])
    x_ref[...] = x

    # --- MLM head after last layer, ONLY on the B CLS rows (rows 0..B-1 in
    #     the (seq, batch)-major layout) -> lane-dense (B, 128) logits ---
    @pl.when(layer == pl.num_programs(0) - 1)
    def _():
        cls = x[0:batch, :]                              # (B, H)
        h = _gelu(jnp.dot(cls.astype(jnp.bfloat16), mlm_w_ref[...],
                          preferred_element_type=jnp.float32) + mlm_b_ref[...])
        h = _ln(h, mlm_ln_g_ref[...], mlm_ln_b_ref[...])
        out_ref[...] = jnp.dot(h.astype(jnp.bfloat16), dec_w_ref[...],
                               preferred_element_type=jnp.float32) + dec_b_ref[...]


# --------------------------- parameters -------------------------------------

def init_params(key):
    def nrm(k, shape):
        return (0.02 * jax.random.normal(k, shape)).astype(jnp.float32)

    keys = iter(jax.random.split(key, 64))
    scale = 1.0 / float(HEAD_DIM) ** 0.5

    layers = []
    for _ in range(N_LAYERS):
        wq = nrm(next(keys), (HIDDEN, HIDDEN)) * scale      # fold 1/sqrt(Dh)
        wk = nrm(next(keys), (HIDDEN, HIDDEN))
        wv = nrm(next(keys), (HIDDEN, HIDDEN))
        wo = nrm(next(keys), (HIDDEN, HIDDEN))
        layers.append(dict(
            wqkv=jnp.concatenate([wq, wk, wv], axis=1),     # (H, 3H)
            bqkv=jnp.zeros((1, 3 * HIDDEN), jnp.float32),
            wo=wo.reshape(N_HEADS, HEAD_DIM, HIDDEN),       # per-head layout
            bo=jnp.zeros((1, HIDDEN), jnp.float32),
            ln1_g=jnp.ones((1, HIDDEN), jnp.float32),
            ln1_b=jnp.zeros((1, HIDDEN), jnp.float32),
            w1=nrm(next(keys), (HIDDEN, FFN)),
            b1=jnp.zeros((1, FFN), jnp.float32),
            w2=nrm(next(keys), (FFN, HIDDEN)),
            b2=jnp.zeros((1, HIDDEN), jnp.float32),
            ln2_g=jnp.ones((1, HIDDEN), jnp.float32),
            ln2_b=jnp.zeros((1, HIDDEN), jnp.float32),
        ))
    stacked = {k: jnp.stack([lyr[k] for lyr in layers]) for k in layers[0]}
    for k in ("wqkv", "wo", "w1", "w2"):                    # bf16 matmul weights
        stacked[k] = stacked[k].astype(jnp.bfloat16)

    dec_w = nrm(next(keys), (HIDDEN, VOCAB))
    dec_w_pad = jnp.zeros((HIDDEN, VOCAB_PAD), jnp.float32).at[:, :VOCAB].set(dec_w)

    return dict(
        word_emb=nrm(next(keys), (VOCAB, HIDDEN)),
        pos_emb=nrm(next(keys), (MAX_POS, HIDDEN)),
        type_emb=nrm(next(keys), (TYPE_VOCAB, HIDDEN)),
        emb_ln_g=jnp.ones((1, HIDDEN), jnp.float32),
        emb_ln_b=jnp.zeros((1, HIDDEN), jnp.float32),
        layers=stacked,
        mlm_dense_w=nrm(next(keys), (HIDDEN, HIDDEN)).astype(jnp.bfloat16),
        mlm_dense_b=jnp.zeros((1, HIDDEN), jnp.float32),
        mlm_ln_g=jnp.ones((1, HIDDEN), jnp.float32),
        mlm_ln_b=jnp.zeros((1, HIDDEN), jnp.float32),
        decoder_w=dec_w_pad.astype(jnp.bfloat16),           # (H, 128) padded
        decoder_b=jnp.zeros((1, VOCAB_PAD), jnp.float32),
    )


# --------------------------- forward ----------------------------------------

@jax.jit
def bert_cls_forward(params, input_ids, token_type_ids, attention_mask):
    """Equivalent of BertClsLayer.forward: returns logits[:, 0, :]."""
    # .squeeze(1) as in the PyTorch module
    input_ids = input_ids[:, 0, :]
    token_type_ids = token_type_ids[:, 0, :]
    attention_mask = attention_mask[:, 0, :]
    B, S = input_ids.shape
    assert S <= MAX_POS, "sequence length exceeds MAX_POS"

    # Embedding gathers stay in plain JAX (glue).  Token rows are laid out
    # (seq, batch)-major so the CLS tokens are the first B rows in-kernel.
    emb = (params["word_emb"][input_ids]
           + params["pos_emb"][jnp.arange(S)][None, :, :]
           + params["type_emb"][token_type_ids]).astype(jnp.float32)   # (B,S,H)
    emb = jnp.transpose(emb, (1, 0, 2)).reshape(S * B, HIDDEN)

    # Additive mask for the block-diagonal fused attention.
    # row/col index = h*(S*B) + s*B + b ; a key column is visible iff it is
    # the same head, same batch, and not a padding position.
    rows = N_HEADS * S * B
    idx = jnp.arange(rows)
    h_idx = idx // (S * B)
    s_idx = (idx % (S * B)) // B
    b_idx = idx % B
    same = (h_idx[:, None] == h_idx[None, :]) & (b_idx[:, None] == b_idx[None, :])
    key_ok = attention_mask.astype(bool)[b_idx, s_idx]                 # (rows,)
    add_mask = jnp.where(same & key_ok[None, :], 0.0, NEG_INF).astype(jnp.float32)

    L = params["layers"]

    def per_layer(shape):
        return pl.BlockSpec((None,) + shape, lambda l: (l,) + (0,) * len(shape))

    def const(shape):
        return pl.BlockSpec(shape, lambda l: (0,) * len(shape))

    grid_spec = pltpu.PrefetchScalarGridSpec(
        num_scalar_prefetch=0,
        grid=(N_LAYERS,),
        in_specs=[
            const((S * B, HIDDEN)),                                  # emb
            const((rows, rows)),                                     # additive mask
            const((1, HIDDEN)), const((1, HIDDEN)),                  # emb LN
            per_layer((HIDDEN, 3 * HIDDEN)), per_layer((1, 3 * HIDDEN)),  # wqkv,bqkv
            per_layer((N_HEADS, HEAD_DIM, HIDDEN)), per_layer((1, HIDDEN)),  # wo, bo
            per_layer((1, HIDDEN)), per_layer((1, HIDDEN)),          # ln1
            per_layer((HIDDEN, FFN)), per_layer((1, FFN)),           # w1, b1
            per_layer((FFN, HIDDEN)), per_layer((1, HIDDEN)),        # w2, b2
            per_layer((1, HIDDEN)), per_layer((1, HIDDEN)),          # ln2
            const((HIDDEN, HIDDEN)), const((1, HIDDEN)),             # mlm dense
            const((1, HIDDEN)), const((1, HIDDEN)),                  # mlm LN
            const((HIDDEN, VOCAB_PAD)), const((1, VOCAB_PAD)),       # decoder
        ],
        out_specs=pl.BlockSpec((B, VOCAB_PAD), lambda l: (0, 0)),
        scratch_shapes=[
            pltpu.VMEM((S * B, HIDDEN), jnp.float32),   # resident hidden state
        ],
    )

    logits_pad = pl.pallas_call(
        functools.partial(_bert_fused_kernel, batch=B, seq=S),
        out_shape=jax.ShapeDtypeStruct((B, VOCAB_PAD), jnp.float32),
        grid_spec=grid_spec,
        compiler_params=pltpu.CompilerParams(
            # layer axis carries the hidden state -> sequential
            dimension_semantics=("arbitrary",)),
    )(
        emb, add_mask, params["emb_ln_g"], params["emb_ln_b"],
        L["wqkv"], L["bqkv"], L["wo"], L["bo"], L["ln1_g"], L["ln1_b"],
        L["w1"], L["b1"], L["w2"], L["b2"], L["ln2_g"], L["ln2_b"],
        params["mlm_dense_w"], params["mlm_dense_b"],
        params["mlm_ln_g"], params["mlm_ln_b"],
        params["decoder_w"], params["decoder_b"],
    )

    return logits_pad[:, :VOCAB]            # cls = logits[:, 0, :]


# ------------------------------ main -----------------------------------------

if __name__ == "__main__":
    B, S = 2, 8
    key = jax.random.PRNGKey(0)
    k_param, k_ids, k_type = jax.random.split(key, 3)

    params = init_params(k_param)

    input_ids = jax.random.randint(k_ids, (B, 1, S), 0, VOCAB, dtype=jnp.int32)
    token_type_ids = jax.random.randint(k_type, (B, 1, S), 0, TYPE_VOCAB,
                                        dtype=jnp.int32)
    # Attention mask with a couple of padding positions at the end of batch 1.
    attention_mask = jnp.ones((B, 1, S), jnp.int32)
    attention_mask = attention_mask.at[1, 0, -2:].set(0)

    cls = bert_cls_forward(params, input_ids, token_type_ids, attention_mask)
    cls = jax.block_until_ready(cls)

    assert cls.shape == (B, VOCAB), cls.shape
    assert bool(jnp.all(jnp.isfinite(cls)))
    print("KERNEL_OK")
</pallas_src>

<mosaic_0001>
module attributes {stable_mosaic.version = 11 : i64} {
  func.func @_bert_fused_kernel(%arg0: i32, %arg1: memref<16x32xf32, #tpu.memory_space<vmem>>, %arg2: memref<64x64xf32, #tpu.memory_space<vmem>>, %arg3: memref<1x32xf32, #tpu.memory_space<vmem>>, %arg4: memref<1x32xf32, #tpu.memory_space<vmem>>, %arg5: memref<1x32x96xbf16, #tpu.memory_space<vmem>>, %arg6: memref<1x1x96xf32, #tpu.memory_space<vmem>>, %arg7: memref<1x4x8x32xbf16, #tpu.memory_space<vmem>>, %arg8: memref<1x1x32xf32, #tpu.memory_space<vmem>>, %arg9: memref<1x1x32xf32, #tpu.memory_space<vmem>>, %arg10: memref<1x1x32xf32, #tpu.memory_space<vmem>>, %arg11: memref<1x32x64xbf16, #tpu.memory_space<vmem>>, %arg12: memref<1x1x64xf32, #tpu.memory_space<vmem>>, %arg13: memref<1x64x32xbf16, #tpu.memory_space<vmem>>, %arg14: memref<1x1x32xf32, #tpu.memory_space<vmem>>, %arg15: memref<1x1x32xf32, #tpu.memory_space<vmem>>, %arg16: memref<1x1x32xf32, #tpu.memory_space<vmem>>, %arg17: memref<32x32xbf16, #tpu.memory_space<vmem>>, %arg18: memref<1x32xf32, #tpu.memory_space<vmem>>, %arg19: memref<1x32xf32, #tpu.memory_space<vmem>>, %arg20: memref<1x32xf32, #tpu.memory_space<vmem>>, %arg21: memref<32x128xbf16, #tpu.memory_space<vmem>>, %arg22: memref<1x128xf32, #tpu.memory_space<vmem>>, %arg23: memref<2x128xf32, #tpu.memory_space<vmem>>, %arg24: memref<16x32xf32, #tpu.memory_space<vmem>>) attributes {dimension_semantics = [#tpu.dimension_semantics<arbitrary>], iteration_bounds = array<i64: 2>, scalar_prefetch = 0 : i64, scratch_operands = 1 : i64, tpu.core_type = #tpu.core_type<tc>, window_params = [{pipeline_mode = #tpu.pipeline_mode<synchronous>, transform_indices = @transform_0, window_bounds = array<i64: 16, 32>}, {pipeline_mode = #tpu.pipeline_mode<synchronous>, transform_indices = @transform_1, window_bounds = array<i64: 64, 64>}, {pipeline_mode = #tpu.pipeline_mode<synchronous>, transform_indices = @transform_2, window_bounds = array<i64: 1, 32>}, {pipeline_mode = #tpu.pipeline_mode<synchronous>, transform_indices = @transform_3, window_bounds = array<i64: 1, 32>}, {transform_indices = @transform_4, window_bounds = array<i64: 1, 32, 96>}, {transform_indices = @transform_5, window_bounds = array<i64: 1, 1, 96>}, {transform_indices = @transform_6, window_bounds = array<i64: 1, 4, 8, 32>}, {transform_indices = @transform_7, window_bounds = array<i64: 1, 1, 32>}, {transform_indices = @transform_8, window_bounds = array<i64: 1, 1, 32>}, {transform_indices = @transform_9, window_bounds = array<i64: 1, 1, 32>}, {transform_indices = @transform_10, window_bounds = array<i64: 1, 32, 64>}, {transform_indices = @transform_11, window_bounds = array<i64: 1, 1, 64>}, {transform_indices = @transform_12, window_bounds = array<i64: 1, 64, 32>}, {transform_indices = @transform_13, window_bounds = array<i64: 1, 1, 32>}, {transform_indices = @transform_14, window_bounds = array<i64: 1, 1, 32>}, {transform_indices = @transform_15, window_bounds = array<i64: 1, 1, 32>}, {pipeline_mode = #tpu.pipeline_mode<synchronous>, transform_indices = @transform_16, window_bounds = array<i64: 32, 32>}, {pipeline_mode = #tpu.pipeline_mode<synchronous>, transform_indices = @transform_17, window_bounds = array<i64: 1, 32>}, {pipeline_mode = #tpu.pipeline_mode<synchronous>, transform_indices = @transform_18, window_bounds = array<i64: 1, 32>}, {pipeline_mode = #tpu.pipeline_mode<synchronous>, transform_indices = @transform_19, window_bounds = array<i64: 1, 32>}, {pipeline_mode = #tpu.pipeline_mode<synchronous>, transform_indices = @transform_20, window_bounds = array<i64: 32, 128>}, {pipeline_mode = #tpu.pipeline_mode<synchronous>, transform_indices = @transform_21, window_bounds = array<i64: 1, 128>}, {pipeline_mode = #tpu.pipeline_mode<synchronous>, transform_indices = @transform_22, window_bounds = array<i64: 2, 128>}]} {
    %c0_i32 = arith.constant 0 : i32
    %0 = arith.cmpi eq, %arg0, %c0_i32 : i32
    %1 = arith.extui %0 : i1 to i32
    %c0_i32_0 = arith.constant 0 : i32
    %2 = arith.cmpi ne, %1, %c0_i32_0 : i32
    scf.if %2 {
      %c0_77 = arith.constant 0 : index
      %c0_78 = arith.constant 0 : index
      %156 = vector.load %arg1[%c0_77, %c0_78] : memref<16x32xf32, #tpu.memory_space<vmem>>, vector<16x32xf32>
      %c0_79 = arith.constant 0 : index
      %c0_80 = arith.constant 0 : index
      %157 = vector.load %arg3[%c0_79, %c0_80] : memref<1x32xf32, #tpu.memory_space<vmem>>, vector<1x32xf32>
      %c0_81 = arith.constant 0 : index
      %c0_82 = arith.constant 0 : index
      %158 = vector.load %arg4[%c0_81, %c0_82] : memref<1x32xf32, #tpu.memory_space<vmem>>, vector<1x32xf32>
      %cst_83 = arith.constant dense<0.000000e+00> : vector<16xf32>
      %159 = vector.multi_reduction <add>, %156, %cst_83 [1] : vector<16x32xf32> to vector<16xf32>
      %160 = vector.shape_cast %159 : vector<16xf32> to vector<16x1xf32>
      %cst_84 = arith.constant 3.200000e+01 : f32
      %161 = vector.broadcast %cst_84 : f32 to vector<16x1xf32>
      %162 = arith.divf %160, %161 : vector<16x1xf32>
      %163 = vector.broadcast %162 : vector<16x1xf32> to vector<16x32xf32>
      %164 = arith.subf %156, %163 : vector<16x32xf32>
      %165 = arith.mulf %164, %164 : vector<16x32xf32>
      %cst_85 = arith.constant dense<0.000000e+00> : vector<16xf32>
      %166 = vector.multi_reduction <add>, %165, %cst_85 [1] : vector<16x32xf32> to vector<16xf32>
      %167 = vector.shape_cast %166 : vector<16xf32> to vector<16x1xf32>
      %cst_86 = arith.constant 3.200000e+01 : f32
      %168 = vector.broadcast %cst_86 : f32 to vector<16x1xf32>
      %169 = arith.divf %167, %168 : vector<16x1xf32>
      %170 = vector.broadcast %162 : vector<16x1xf32> to vector<16x32xf32>
      %171 = arith.subf %156, %170 : vector<16x32xf32>
      %cst_87 = arith.constant 9.99999996E-13 : f32
      %172 = vector.broadcast %cst_87 : f32 to vector<16x1xf32>
      %173 = arith.addf %169, %172 : vector<16x1xf32>
      %174 = math.rsqrt %173 : vector<16x1xf32>
      %175 = vector.broadcast %174 : vector<16x1xf32> to vector<16x32xf32>
      %176 = arith.mulf %171, %175 : vector<16x32xf32>
      %177 = vector.broadcast %157 : vector<1x32xf32> to vector<16x32xf32>
      %178 = arith.mulf %176, %177 : vector<16x32xf32>
      %179 = vector.broadcast %158 : vector<1x32xf32> to vector<16x32xf32>
      %180 = arith.addf %178, %179 : vector<16x32xf32>
      %c0_88 = arith.constant 0 : index
      %c0_89 = arith.constant 0 : index
      %181 = vector.load %arg24[%c0_88, %c0_89] : memref<16x32xf32, #tpu.memory_space<vmem>>, vector<16x32xf32>
      tpu.vector_store %arg24[%c0_88, %c0_89], %180 {strides = array<i32>} : memref<16x32xf32, #tpu.memory_space<vmem>>, vector<16x32xf32>,
    } else {
    }
    %c0 = arith.constant 0 : index
    %c0_1 = arith.constant 0 : index
    %3 = vector.load %arg24[%c0, %c0_1] : memref<16x32xf32, #tpu.memory_space<vmem>>, vector<16x32xf32>
    %4 = arith.truncf %3 : vector<16x32xf32> to vector<16x32xbf16>
    %c0_2 = arith.constant 0 : index
    %c0_3 = arith.constant 0 : index
    %c0_4 = arith.constant 0 : index
    %5 = vector.load %arg5[%c0_2, %c0_3, %c0_4] : memref<1x32x96xbf16, #tpu.memory_space<vmem>>, vector<1x32x96xbf16>
    %6 = vector.shape_cast %5 : vector<1x32x96xbf16> to vector<32x96xbf16>
    %cst = arith.constant dense<0.000000e+00> : vector<16x96xf32>
    %7 = tpu.matmul %4, %6, %cst {dimension_numbers = #tpu.dot_dimension_numbers<[1], [0], [0], [1], [0, 0, 1, 1], [], []>} : vector<16x32xbf16>, vector<32x96xbf16>, vector<16x96xf32> -> vector<16x96xf32>
    %c0_5 = arith.constant 0 : index
    %c0_6 = arith.constant 0 : index
    %c0_7 = arith.constant 0 : index
    %8 = vector.load %arg6[%c0_5, %c0_6, %c0_7] : memref<1x1x96xf32, #tpu.memory_space<vmem>>, vector<1x1x96xf32>
    %9 = vector.shape_cast %8 : vector<1x1x96xf32> to vector<1x96xf32>
    %10 = vector.broadcast %9 : vector<1x96xf32> to vector<16x96xf32>
    %11 = arith.addf %7, %10 : vector<16x96xf32>
    %12 = vector.extract_strided_slice %11 {offsets = [0, 0], sizes = [16, 8], strides = [1, 1]} : vector<16x96xf32> to vector<16x8xf32>
    %13 = vector.extract_strided_slice %11 {offsets = [0, 8], sizes = [16, 8], strides = [1, 1]} : vector<16x96xf32> to vector<16x8xf32>
    %14 = vector.extract_strided_slice %11 {offsets = [0, 16], sizes = [16, 8], strides = [1, 1]} : vector<16x96xf32> to vector<16x8xf32>
    %15 = vector.extract_strided_slice %11 {offsets = [0, 24], sizes = [16, 8], strides = [1, 1]} : vector<16x96xf32> to vector<16x8xf32>
    %16 = tpu.concatenate %12, %13, %14, %15 in 0 : vector<16x8xf32>, vector<16x8xf32>, vector<16x8xf32>, vector<16x8xf32> -> vector<64x8xf32>
    %17 = arith.truncf %16 : vector<64x8xf32> to vector<64x8xbf16>
    %18 = vector.extract_strided_slice %11 {offsets = [0, 32], sizes = [16, 8], strides = [1, 1]} : vector<16x96xf32> to vector<16x8xf32>
    %19 = vector.extract_strided_slice %11 {offsets = [0, 40], sizes = [16, 8], strides = [1, 1]} : vector<16x96xf32> to vector<16x8xf32>
    %20 = vector.extract_strided_slice %11 {offsets = [0, 48], sizes = [16, 8], strides = [1, 1]} : vector<16x96xf32> to vector<16x8xf32>
    %21 = vector.extract_strided_slice %11 {offsets = [0, 56], sizes = [16, 8], strides = [1, 1]} : vector<16x96xf32> to vector<16x8xf32>
    %22 = tpu.concatenate %18, %19, %20, %21 in 0 : vector<16x8xf32>, vector<16x8xf32>, vector<16x8xf32>, vector<16x8xf32> -> vector<64x8xf32>
    %23 = arith.truncf %22 : vector<64x8xf32> to vector<64x8xbf16>
    %24 = vector.extract_strided_slice %11 {offsets = [0, 64], sizes = [16, 8], strides = [1, 1]} : vector<16x96xf32> to vector<16x8xf32>
    %25 = vector.extract_strided_slice %11 {offsets = [0, 72], sizes = [16, 8], strides = [1, 1]} : vector<16x96xf32> to vector<16x8xf32>
    %26 = vector.extract_strided_slice %11 {offsets = [0, 80], sizes = [16, 8], strides = [1, 1]} : vector<16x96xf32> to vector<16x8xf32>
    %27 = vector.extract_strided_slice %11 {offsets = [0, 88], sizes = [16, 8], strides = [1, 1]} : vector<16x96xf32> to vector<16x8xf32>
    %28 = tpu.concatenate %24, %25, %26, %27 in 0 : vector<16x8xf32>, vector<16x8xf32>, vector<16x8xf32>, vector<16x8xf32> -> vector<64x8xf32>
    %29 = arith.truncf %28 : vector<64x8xf32> to vector<64x8xbf16>
    %cst_8 = arith.constant dense<0.000000e+00> : vector<64x64xf32>
    %30 = tpu.matmul %17, %23, %cst_8 {dimension_numbers = #tpu.dot_dimension_numbers<[1], [1], [0], [0], [0, 0, 1, 0], [], []>} : vector<64x8xbf16>, vector<64x8xbf16>, vector<64x64xf32> -> vector<64x64xf32>
    %c0_9 = arith.constant 0 : index
    %c0_10 = arith.constant 0 : index
    %31 = vector.load %arg2[%c0_9, %c0_10] : memref<64x64xf32, #tpu.memory_space<vmem>>, vector<64x64xf32>
    %32 = arith.addf %30, %31 : vector<64x64xf32>
    %cst_11 = arith.constant dense<0xFF800000> : vector<64xf32>
    %33 = vector.multi_reduction <maximumf>, %32, %cst_11 [1] : vector<64x64xf32> to vector<64xf32>
    %34 = vector.shape_cast %33 : vector<64xf32> to vector<64x1xf32>
    %35 = vector.broadcast %34 : vector<64x1xf32> to vector<64x64xf32>
    %36 = arith.subf %32, %35 : vector<64x64xf32>
    %37 = math.exp %36 : vector<64x64xf32>
    %cst_12 = arith.constant dense<0.000000e+00> : vector<64xf32>
    %38 = vector.multi_reduction <add>, %37, %cst_12 [1] : vector<64x64xf32> to vector<64xf32>
    %39 = vector.shape_cast %38 : vector<64xf32> to vector<64x1xf32>
    %40 = tpu.reciprocal %39 {approx = true} : vector<64x1xf32> -> vector<64x1xf32>
    %41 = vector.broadcast %40 : vector<64x1xf32> to vector<64x64xf32>
    %42 = arith.mulf %37, %41 : vector<64x64xf32>
    %43 = arith.truncf %42 : vector<64x64xf32> to vector<64x64xbf16>
    %cst_13 = arith.constant dense<0.000000e+00> : vector<64x8xf32>
    %44 = tpu.matmul %43, %29, %cst_13 {dimension_numbers = #tpu.dot_dimension_numbers<[1], [0], [0], [1], [0, 0, 1, 1], [], []>} : vector<64x64xbf16>, vector<64x8xbf16>, vector<64x8xf32> -> vector<64x8xf32>
    %45 = arith.truncf %44 : vector<64x8xf32> to vector<64x8xbf16>
    %c0_14 = arith.constant 0 : index
    %c0_15 = arith.constant 0 : index
    %c0_16 = arith.constant 0 : index
    %46 = vector.load %arg8[%c0_14, %c0_15, %c0_16] : memref<1x1x32xf32, #tpu.memory_space<vmem>>, vector<1x1x32xf32>
    %47 = vector.shape_cast %46 : vector<1x1x32xf32> to vector<1x32xf32>
    %48 = vector.extract_strided_slice %45 {offsets = [0, 0], sizes = [16, 8], strides = [1, 1]} : vector<64x8xbf16> to vector<16x8xbf16>
    %c0_17 = arith.constant 0 : index
    %c0_18 = arith.constant 0 : index
    %c0_19 = arith.constant 0 : index
    %c0_20 = arith.constant 0 : index
    %49 = vector.load %arg7[%c0_17, %c0_18, %c0_19, %c0_20] : memref<1x4x8x32xbf16, #tpu.memory_space<vmem>>, vector<1x1x8x32xbf16>
    %50 = vector.shape_cast %49 : vector<1x1x8x32xbf16> to vector<8x32xbf16>
    %cst_21 = arith.constant dense<0.000000e+00> : vector<16x32xf32>
    %51 = tpu.matmul %48, %50, %cst_21 {dimension_numbers = #tpu.dot_dimension_numbers<[1], [0], [0], [1], [0, 0, 1, 1], [], []>} : vector<16x8xbf16>, vector<8x32xbf16>, vector<16x32xf32> -> vector<16x32xf32>
    %52 = vector.broadcast %47 : vector<1x32xf32> to vector<16x32xf32>
    %53 = arith.addf %52, %51 : vector<16x32xf32>
    %54 = vector.extract_strided_slice %45 {offsets = [16, 0], sizes = [16, 8], strides = [1, 1]} : vector<64x8xbf16> to vector<16x8xbf16>
    %c0_22 = arith.constant 0 : index
    %c1 = arith.constant 1 : index
    %c0_23 = arith.constant 0 : index
    %c0_24 = arith.constant 0 : index
    %55 = vector.load %arg7[%c0_22, %c1, %c0_23, %c0_24] : memref<1x4x8x32xbf16, #tpu.memory_space<vmem>>, vector<1x1x8x32xbf16>
    %56 = vector.shape_cast %55 : vector<1x1x8x32xbf16> to vector<8x32xbf16>
    %cst_25 = arith.constant dense<0.000000e+00> : vector<16x32xf32>
    %57 = tpu.matmul %54, %56, %cst_25 {dimension_numbers = #tpu.dot_dimension_numbers<[1], [0], [0], [1], [0, 0, 1, 1], [], []>} : vector<16x8xbf16>, vector<8x32xbf16>, vector<16x32xf32> -> vector<16x32xf32>
    %58 = arith.addf %53, %57 : vector<16x32xf32>
    %59 = vector.extract_strided_slice %45 {offsets = [32, 0], sizes = [16, 8], strides = [1, 1]} : vector<64x8xbf16> to vector<16x8xbf16>
    %c0_26 = arith.constant 0 : index
    %c2 = arith.constant 2 : index
    %c0_27 = arith.constant 0 : index
    %c0_28 = arith.constant 0 : index
    %60 = vector.load %arg7[%c0_26, %c2, %c0_27, %c0_28] : memref<1x4x8x32xbf16, #tpu.memory_space<vmem>>, vector<1x1x8x32xbf16>
    %61 = vector.shape_cast %60 : vector<1x1x8x32xbf16> to vector<8x32xbf16>
    %cst_29 = arith.constant dense<0.000000e+00> : vector<16x32xf32>
    %62 = tpu.matmul %59, %61, %cst_29 {dimension_numbers = #tpu.dot_dimension_numbers<[1], [0], [0], [1], [0, 0, 1, 1], [], []>} : vector<16x8xbf16>, vector<8x32xbf16>, vector<16x32xf32> -> vector<16x32xf32>
    %63 = arith.addf %58, %62 : vector<16x32xf32>
    %64 = vector.extract_strided_slice %45 {offsets = [48, 0], sizes = [16, 8], strides = [1, 1]} : vector<64x8xbf16> to vector<16x8xbf16>
    %c0_30 = arith.constant 0 : index
    %c3 = arith.constant 3 : index
    %c0_31 = arith.constant 0 : index
    %c0_32 = arith.constant 0 : index
    %65 = vector.load %arg7[%c0_30, %c3, %c0_31, %c0_32] : memref<1x4x8x32xbf16, #tpu.memory_space<vmem>>, vector<1x1x8x32xbf16>
    %66 = vector.shape_cast %65 : vector<1x1x8x32xbf16> to vector<8x32xbf16>
    %cst_33 = arith.constant dense<0.000000e+00> : vector<16x32xf32>
    %67 = tpu.matmul %64, %66, %cst_33 {dimension_numbers = #tpu.dot_dimension_numbers<[1], [0], [0], [1], [0, 0, 1, 1], [], []>} : vector<16x8xbf16>, vector<8x32xbf16>, vector<16x32xf32> -> vector<16x32xf32>
    %68 = arith.addf %63, %67 : vector<16x32xf32>
    %69 = arith.addf %68, %3 : vector<16x32xf32>
    %c0_34 = arith.constant 0 : index
    %c0_35 = arith.constant 0 : index
    %c0_36 = arith.constant 0 : index
    %70 = vector.load %arg9[%c0_34, %c0_35, %c0_36] : memref<1x1x32xf32, #tpu.memory_space<vmem>>, vector<1x1x32xf32>
    %71 = vector.shape_cast %70 : vector<1x1x32xf32> to vector<1x32xf32>
    %c0_37 = arith.constant 0 : index
    %c0_38 = arith.constant 0 : index
    %c0_39 = arith.constant 0 : index
    %72 = vector.load %arg10[%c0_37, %c0_38, %c0_39] : memref<1x1x32xf32, #tpu.memory_space<vmem>>, vector<1x1x32xf32>
    %73 = vector.shape_cast %72 : vector<1x1x32xf32> to vector<1x32xf32>
    %cst_40 = arith.constant dense<0.000000e+00> : vector<16xf32>
    %74 = vector.multi_reduction <add>, %69, %cst_40 [1] : vector<16x32xf32> to vector<16xf32>
    %75 = vector.shape_cast %74 : vector<16xf32> to vector<16x1xf32>
    %cst_41 = arith.constant 3.200000e+01 : f32
    %76 = vector.broadcast %cst_41 : f32 to vector<16x1xf32>
    %77 = arith.divf %75, %76 : vector<16x1xf32>
    %78 = vector.broadcast %77 : vector<16x1xf32> to vector<16x32xf32>
    %79 = arith.subf %69, %78 : vector<16x32xf32>
    %80 = arith.mulf %79, %79 : vector<16x32xf32>
    %cst_42 = arith.constant dense<0.000000e+00> : vector<16xf32>
    %81 = vector.multi_reduction <add>, %80, %cst_42 [1] : vector<16x32xf32> to vector<16xf32>
    %82 = vector.shape_cast %81 : vector<16xf32> to vector<16x1xf32>
    %cst_43 = arith.constant 3.200000e+01 : f32
    %83 = vector.broadcast %cst_43 : f32 to vector<16x1xf32>
    %84 = arith.divf %82, %83 : vector<16x1xf32>
    %85 = vector.broadcast %77 : vector<16x1xf32> to vector<16x32xf32>
    %86 = arith.subf %69, %85 : vector<16x32xf32>
    %cst_44 = arith.constant 9.99999996E-13 : f32
    %87 = vector.broadcast %cst_44 : f32 to vector<16x1xf32>
    %88 = arith.addf %84, %87 : vector<16x1xf32>
    %89 = math.rsqrt %88 : vector<16x1xf32>
    %90 = vector.broadcast %89 : vector<16x1xf32> to vector<16x32xf32>
    %91 = arith.mulf %86, %90 : vector<16x32xf32>
    %92 = vector.broadcast %71 : vector<1x32xf32> to vector<16x32xf32>
    %93 = arith.mulf %91, %92 : vector<16x32xf32>
    %94 = vector.broadcast %73 : vector<1x32xf32> to vector<16x32xf32>
    %95 = arith.addf %93, %94 : vector<16x32xf32>
    %96 = arith.truncf %95 : vector<16x32xf32> to vector<16x32xbf16>
    %c0_45 = arith.constant 0 : index
    %c0_46 = arith.constant 0 : index
    %c0_47 = arith.constant 0 : index
    %97 = vector.load %arg11[%c0_45, %c0_46, %c0_47] : memref<1x32x64xbf16, #tpu.memory_space<vmem>>, vector<1x32x64xbf16>
    %98 = vector.shape_cast %97 : vector<1x32x64xbf16> to vector<32x64xbf16>
    %cst_48 = arith.constant dense<0.000000e+00> : vector<16x64xf32>
    %99 = tpu.matmul %96, %98, %cst_48 {dimension_numbers = #tpu.dot_dimension_numbers<[1], [0], [0], [1], [0, 0, 1, 1], [], []>} : vector<16x32xbf16>, vector<32x64xbf16>, vector<16x64xf32> -> vector<16x64xf32>
    %c0_49 = arith.constant 0 : index
    %c0_50 = arith.constant 0 : index
    %c0_51 = arith.constant 0 : index
    %100 = vector.load %arg12[%c0_49, %c0_50, %c0_51] : memref<1x1x64xf32, #tpu.memory_space<vmem>>, vector<1x1x64xf32>
    %101 = vector.shape_cast %100 : vector<1x1x64xf32> to vector<1x64xf32>
    %102 = vector.broadcast %101 : vector<1x64xf32> to vector<16x64xf32>
    %103 = arith.addf %99, %102 : vector<16x64xf32>
    %cst_52 = arith.constant 5.000000e-01 : f32
    %104 = vector.broadcast %cst_52 : f32 to vector<16x64xf32>
    %105 = arith.mulf %104, %103 : vector<16x64xf32>
    %cst_53 = arith.constant 4.471500e-02 : f32
    %106 = vector.broadcast %cst_53 : f32 to vector<16x64xf32>
    %107 = arith.mulf %106, %103 : vector<16x64xf32>
    %108 = arith.mulf %107, %103 : vector<16x64xf32>
    %109 = arith.mulf %108, %103 : vector<16x64xf32>
    %110 = arith.addf %103, %109 : vector<16x64xf32>
    %cst_54 = arith.constant 0.797884583 : f32
    %111 = vector.broadcast %cst_54 : f32 to vector<16x64xf32>
    %112 = arith.mulf %111, %110 : vector<16x64xf32>
    %113 = math.tanh %112 : vector<16x64xf32>
    %cst_55 = arith.constant 1.000000e+00 : f32
    %114 = vector.broadcast %cst_55 : f32 to vector<16x64xf32>
    %115 = arith.addf %114, %113 : vector<16x64xf32>
    %116 = arith.mulf %105, %115 : vector<16x64xf32>
    %117 = arith.truncf %116 : vector<16x64xf32> to vector<16x64xbf16>
    %c0_56 = arith.constant 0 : index
    %c0_57 = arith.constant 0 : index
    %c0_58 = arith.constant 0 : index
    %118 = vector.load %arg13[%c0_56, %c0_57, %c0_58] : memref<1x64x32xbf16, #tpu.memory_space<vmem>>, vector<1x64x32xbf16>
    %119 = vector.shape_cast %118 : vector<1x64x32xbf16> to vector<64x32xbf16>
    %cst_59 = arith.constant dense<0.000000e+00> : vector<16x32xf32>
    %120 = tpu.matmul %117, %119, %cst_59 {dimension_numbers = #tpu.dot_dimension_numbers<[1], [0], [0], [1], [0, 0, 1, 1], [], []>} : vector<16x64xbf16>, vector<64x32xbf16>, vector<16x32xf32> -> vector<16x32xf32>
    %c0_60 = arith.constant 0 : index
    %c0_61 = arith.constant 0 : index
    %c0_62 = arith.constant 0 : index
    %121 = vector.load %arg14[%c0_60, %c0_61, %c0_62] : memref<1x1x32xf32, #tpu.memory_space<vmem>>, vector<1x1x32xf32>
    %122 = vector.shape_cast %121 : vector<1x1x32xf32> to vector<1x32xf32>
    %123 = vector.broadcast %122 : vector<1x32xf32> to vector<16x32xf32>
    %124 = arith.addf %120, %123 : vector<16x32xf32>
    %125 = arith.addf %124, %95 : vector<16x32xf32>
    %c0_63 = arith.constant 0 : index
    %c0_64 = arith.constant 0 : index
    %c0_65 = arith.constant 0 : index
    %126 = vector.load %arg15[%c0_63, %c0_64, %c0_65] : memref<1x1x32xf32, #tpu.memory_space<vmem>>, vector<1x1x32xf32>
    %127 = vector.shape_cast %126 : vector<1x1x32xf32> to vector<1x32xf32>
    %c0_66 = arith.constant 0 : index
    %c0_67 = arith.constant 0 : index
    %c0_68 = arith.constant 0 : index
    %128 = vector.load %arg16[%c0_66, %c0_67, %c0_68] : memref<1x1x32xf32, #tpu.memory_space<vmem>>, vector<1x1x32xf32>
    %129 = vector.shape_cast %128 : vector<1x1x32xf32> to vector<1x32xf32>
    %cst_69 = arith.constant dense<0.000000e+00> : vector<16xf32>
    %130 = vector.multi_reduction <add>, %125, %cst_69 [1] : vector<16x32xf32> to vector<16xf32>
    %131 = vector.shape_cast %130 : vector<16xf32> to vector<16x1xf32>
    %cst_70 = arith.constant 3.200000e+01 : f32
    %132 = vector.broadcast %cst_70 : f32 to vector<16x1xf32>
    %133 = arith.divf %131, %132 : vector<16x1xf32>
    %134 = vector.broadcast %133 : vector<16x1xf32> to vector<16x32xf32>
    %135 = arith.subf %125, %134 : vector<16x32xf32>
    %136 = arith.mulf %135, %135 : vector<16x32xf32>
    %cst_71 = arith.constant dense<0.000000e+00> : vector<16xf32>
    %137 = vector.multi_reduction <add>, %136, %cst_71 [1] : vector<16x32xf32> to vector<16xf32>
    %138 = vector.shape_cast %137 : vector<16xf32> to vector<16x1xf32>
    %cst_72 = arith.constant 3.200000e+01 : f32
    %139 = vector.broadcast %cst_72 : f32 to vector<16x1xf32>
    %140 = arith.divf %138, %139 : vector<16x1xf32>
    %141 = vector.broadcast %133 : vector<16x1xf32> to vector<16x32xf32>
    %142 = arith.subf %125, %141 : vector<16x32xf32>
    %cst_73 = arith.constant 9.99999996E-13 : f32
    %143 = vector.broadcast %cst_73 : f32 to vector<16x1xf32>
    %144 = arith.addf %140, %143 : vector<16x1xf32>
    %145 = math.rsqrt %144 : vector<16x1xf32>
    %146 = vector.broadcast %145 : vector<16x1xf32> to vector<16x32xf32>
    %147 = arith.mulf %142, %146 : vector<16x32xf32>
    %148 = vector.broadcast %127 : vector<1x32xf32> to vector<16x32xf32>
    %149 = arith.mulf %147, %148 : vector<16x32xf32>
    %150 = vector.broadcast %129 : vector<1x32xf32> to vector<16x32xf32>
    %151 = arith.addf %149, %150 : vector<16x32xf32>
    %c0_74 = arith.constant 0 : index
    %c0_75 = arith.constant 0 : index
    %152 = vector.load %arg24[%c0_74, %c0_75] : memref<16x32xf32, #tpu.memory_space<vmem>>, vector<16x32xf32>
    tpu.vector_store %arg24[%c0_74, %c0_75], %151 {strides = array<i32>} : memref<16x32xf32, #tpu.memory_space<vmem>>, vector<16x32xf32>,
    %c1_i32 = arith.constant 1 : i32
    %153 = arith.cmpi eq, %arg0, %c1_i32 : i32
    %154 = arith.extui %153 : i1 to i32
    %c0_i32_76 = arith.constant 0 : i32
    %155 = arith.cmpi ne, %154, %c0_i32_76 : i32
    scf.if %155 {
      %156 = vector.extract_strided_slice %151 {offsets = [0, 0], sizes = [2, 32], strides = [1, 1]} : vector<16x32xf32> to vector<2x32xf32>
      %157 = arith.truncf %156 : vector<2x32xf32> to vector<2x32xbf16>
      %c0_77 = arith.constant 0 : index
      %c0_78 = arith.constant 0 : index
      %158 = vector.load %arg17[%c0_77, %c0_78] : memref<32x32xbf16, #tpu.memory_space<vmem>>, vector<32x32xbf16>
      %cst_79 = arith.constant dense<0.000000e+00> : vector<2x32xf32>
      %159 = tpu.matmul %157, %158, %cst_79 {dimension_numbers = #tpu.dot_dimension_numbers<[1], [0], [0], [1], [0, 0, 1, 1], [], []>} : vector<2x32xbf16>, vector<32x32xbf16>, vector<2x32xf32> -> vector<2x32xf32>
      %c0_80 = arith.constant 0 : index
      %c0_81 = arith.constant 0 : index
      %160 = vector.load %arg18[%c0_80, %c0_81] : memref<1x32xf32, #tpu.memory_space<vmem>>, vector<1x32xf32>
      %161 = vector.broadcast %160 : vector<1x32xf32> to vector<2x32xf32>
      %162 = arith.addf %159, %161 : vector<2x32xf32>
      %cst_82 = arith.constant 5.000000e-01 : f32
      %163 = vector.broadcast %cst_82 : f32 to vector<2x32xf32>
      %164 = arith.mulf %163, %162 : vector<2x32xf32>
      %cst_83 = arith.constant 4.471500e-02 : f32
      %165 = vector.broadcast %cst_83 : f32 to vector<2x32xf32>
      %166 = arith.mulf %165, %162 : vector<2x32xf32>
      %167 = arith.mulf %166, %162 : vector<2x32xf32>
      %168 = arith.mulf %167, %162 : vector<2x32xf32>
      %169 = arith.addf %162, %168 : vector<2x32xf32>
      %cst_84 = arith.constant 0.797884583 : f32
      %170 = vector.broadcast %cst_84 : f32 to vector<2x32xf32>
      %171 = arith.mulf %170, %169 : vector<2x32xf32>
      %172 = math.tanh %171 : vector<2x32xf32>
      %cst_85 = arith.constant 1.000000e+00 : f32
      %173 = vector.broadcast %cst_85 : f32 to vector<2x32xf32>
      %174 = arith.addf %173, %172 : vector<2x32xf32>
      %175 = arith.mulf %164, %174 : vector<2x32xf32>
      %c0_86 = arith.constant 0 : index
      %c0_87 = arith.constant 0 : index
      %176 = vector.load %arg19[%c0_86, %c0_87] : memref<1x32xf32, #tpu.memory_space<vmem>>, vector<1x32xf32>
      %c0_88 = arith.constant 0 : index
      %c0_89 = arith.constant 0 : index
      %177 = vector.load %arg20[%c0_88, %c0_89] : memref<1x32xf32, #tpu.memory_space<vmem>>, vector<1x32xf32>
      %cst_90 = arith.constant dense<0.000000e+00> : vector<2xf32>
      %178 = vector.multi_reduction <add>, %175, %cst_90 [1] : vector<2x32xf32> to vector<2xf32>
      %179 = vector.shape_cast %178 : vector<2xf32> to vector<2x1xf32>
      %cst_91 = arith.constant 3.200000e+01 : f32
      %180 = vector.broadcast %cst_91 : f32 to vector<2x1xf32>
      %181 = arith.divf %179, %180 : vector<2x1xf32>
      %182 = vector.broadcast %181 : vector<2x1xf32> to vector<2x32xf32>
      %183 = arith.subf %175, %182 : vector<2x32xf32>
      %184 = arith.mulf %183, %183 : vector<2x32xf32>
      %cst_92 = arith.constant dense<0.000000e+00> : vector<2xf32>
      %185 = vector.multi_reduction <add>, %184, %cst_92 [1] : vector<2x32xf32> to vector<2xf32>
      %186 = vector.shape_cast %185 : vector<2xf32> to vector<2x1xf32>
      %cst_93 = arith.constant 3.200000e+01 : f32
      %187 = vector.broadcast %cst_93 : f32 to vector<2x1xf32>
      %188 = arith.divf %186, %187 : vector<2x1xf32>
      %189 = vector.broadcast %181 : vector<2x1xf32> to vector<2x32xf32>
      %190 = arith.subf %175, %189 : vector<2x32xf32>
      %cst_94 = arith.constant 9.99999996E-13 : f32
      %191 = vector.broadcast %cst_94 : f32 to vector<2x1xf32>
      %192 = arith.addf %188, %191 : vector<2x1xf32>
      %193 = math.rsqrt %192 : vector<2x1xf32>
      %194 = vector.broadcast %193 : vector<2x1xf32> to vector<2x32xf32>
      %195 = arith.mulf %190, %194 : vector<2x32xf32>
      %196 = vector.broadcast %176 : vector<1x32xf32> to vector<2x32xf32>
      %197 = arith.mulf %195, %196 : vector<2x32xf32>
      %198 = vector.broadcast %177 : vector<1x32xf32> to vector<2x32xf32>
      %199 = arith.addf %197, %198 : vector<2x32xf32>
      %200 = arith.truncf %199 : vector<2x32xf32> to vector<2x32xbf16>
      %c0_95 = arith.constant 0 : index
      %c0_96 = arith.constant 0 : index
      %201 = vector.load %arg21[%c0_95, %c0_96] : memref<32x128xbf16, #tpu.memory_space<vmem>>, vector<32x128xbf16>
      %cst_97 = arith.constant dense<0.000000e+00> : vector<2x128xf32>
      %202 = tpu.matmul %200, %201, %cst_97 {dimension_numbers = #tpu.dot_dimension_numbers<[1], [0], [0], [1], [0, 0, 1, 1], [], []>} : vector<2x32xbf16>, vector<32x128xbf16>, vector<2x128xf32> -> vector<2x128xf32>
      %c0_98 = arith.constant 0 : index
      %c0_99 = arith.constant 0 : index
      %203 = vector.load %arg22[%c0_98, %c0_99] : memref<1x128xf32, #tpu.memory_space<vmem>>, vector<1x128xf32>
      %204 = vector.broadcast %203 : vector<1x128xf32> to vector<2x128xf32>
      %205 = arith.addf %202, %204 : vector<2x128xf32>
      %c0_100 = arith.constant 0 : index
      %c0_101 = arith.constant 0 : index
      %206 = vector.load %arg23[%c0_100, %c0_101] : memref<2x128xf32, #tpu.memory_space<vmem>>, vector<2x128xf32>
      tpu.vector_store %arg23[%c0_100, %c0_101], %205 {strides = array<i32>} : memref<2x128xf32, #tpu.memory_space<vmem>>, vector<2x128xf32>,
    } else {
    }
    return
  }
  func.func @transform_0(%arg0: i32) -> (i32, i32) {
    %c0_i32 = arith.constant 0 : i32
    %c0_i32_0 = arith.constant 0 : i32
    %c0_i32_1 = arith.constant 0 : i32
    return %c0_i32, %c0_i32_0 : i32, i32
  }
  func.func @transform_1(%arg0: i32) -> (i32, i32) {
    %c0_i32 = arith.constant 0 : i32
    %c0_i32_0 = arith.constant 0 : i32
    %c0_i32_1 = arith.constant 0 : i32
    return %c0_i32, %c0_i32_0 : i32, i32
  }
  func.func @transform_2(%arg0: i32) -> (i32, i32) {
    %c0_i32 = arith.constant 0 : i32
    %c0_i32_0 = arith.constant 0 : i32
    %c0_i32_1 = arith.constant 0 : i32
    return %c0_i32, %c0_i32_0 : i32, i32
  }
  func.func @transform_3(%arg0: i32) -> (i32, i32) {
    %c0_i32 = arith.constant 0 : i32
    %c0_i32_0 = arith.constant 0 : i32
    %c0_i32_1 = arith.constant 0 : i32
    return %c0_i32, %c0_i32_0 : i32, i32
  }
  func.func @transform_4(%arg0: i32) -> (i32, i32, i32) {
    %c0_i32 = arith.constant 0 : i32
    %c0_i32_0 = arith.constant 0 : i32
    %c0_i32_1 = arith.constant 0 : i32
    return %arg0, %c0_i32, %c0_i32_0 : i32, i32, i32
  }
  func.func @transform_5(%arg0: i32) -> (i32, i32, i32) {
    %c0_i32 = arith.constant 0 : i32
    %c0_i32_0 = arith.constant 0 : i32
    %c0_i32_1 = arith.constant 0 : i32
    return %arg0, %c0_i32, %c0_i32_0 : i32, i32, i32
  }
  func.func @transform_6(%arg0: i32) -> (i32, i32, i32, i32) {
    %c0_i32 = arith.constant 0 : i32
    %c0_i32_0 = arith.constant 0 : i32
    %c0_i32_1 = arith.constant 0 : i32
    %c0_i32_2 = arith.constant 0 : i32
    return %arg0, %c0_i32, %c0_i32_0, %c0_i32_1 : i32, i32, i32, i32
  }
  func.func @transform_7(%arg0: i32) -> (i32, i32, i32) {
    %c0_i32 = arith.constant 0 : i32
    %c0_i32_0 = arith.constant 0 : i32
    %c0_i32_1 = arith.constant 0 : i32
    return %arg0, %c0_i32, %c0_i32_0 : i32, i32, i32
  }
  func.func @transform_8(%arg0: i32) -> (i32, i32, i32) {
    %c0_i32 = arith.constant 0 : i32
    %c0_i32_0 = arith.constant 0 : i32
    %c0_i32_1 = arith.constant 0 : i32
    return %arg0, %c0_i32, %c0_i32_0 : i32, i32, i32
  }
  func.func @transform_9(%arg0: i32) -> (i32, i32, i32) {
    %c0_i32 = arith.constant 0 : i32
    %c0_i32_0 = arith.constant 0 : i32
    %c0_i32_1 = arith.constant 0 : i32
    return %arg0, %c0_i32, %c0_i32_0 : i32, i32, i32
  }
  func.func @transform_10(%arg0: i32) -> (i32, i32, i32) {
    %c0_i32 = arith.constant 0 : i32
    %c0_i32_0 = arith.constant 0 : i32
    %c0_i32_1 = arith.constant 0 : i32
    return %arg0, %c0_i32, %c0_i32_0 : i32, i32, i32
  }
  func.func @transform_11(%arg0: i32) -> (i32, i32, i32) {
    %c0_i32 = arith.constant 0 : i32
    %c0_i32_0 = arith.constant 0 : i32
    %c0_i32_1 = arith.constant 0 : i32
    return %arg0, %c0_i32, %c0_i32_0 : i32, i32, i32
  }
  func.func @transform_12(%arg0: i32) -> (i32, i32, i32) {
    %c0_i32 = arith.constant 0 : i32
    %c0_i32_0 = arith.constant 0 : i32
    %c0_i32_1 = arith.constant 0 : i32
    return %arg0, %c0_i32, %c0_i32_0 : i32, i32, i32
  }
  func.func @transform_13(%arg0: i32) -> (i32, i32, i32) {
    %c0_i32 = arith.constant 0 : i32
    %c0_i32_0 = arith.constant 0 : i32
    %c0_i32_1 = arith.constant 0 : i32
    return %arg0, %c0_i32, %c0_i32_0 : i32, i32, i32
  }
  func.func @transform_14(%arg0: i32) -> (i32, i32, i32) {
    %c0_i32 = arith.constant 0 : i32
    %c0_i32_0 = arith.constant 0 : i32
    %c0_i32_1 = arith.constant 0 : i32
    return %arg0, %c0_i32, %c0_i32_0 : i32, i32, i32
  }
  func.func @transform_15(%arg0: i32) -> (i32, i32, i32) {
    %c0_i32 = arith.constant 0 : i32
    %c0_i32_0 = arith.constant 0 : i32
    %c0_i32_1 = arith.constant 0 : i32
    return %arg0, %c0_i32, %c0_i32_0 : i32, i32, i32
  }
  func.func @transform_16(%arg0: i32) -> (i32, i32) {
    %c0_i32 = arith.constant 0 : i32
    %c0_i32_0 = arith.constant 0 : i32
    %c0_i32_1 = arith.constant 0 : i32
    return %c0_i32, %c0_i32_0 : i32, i32
  }
  func.func @transform_17(%arg0: i32) -> (i32, i32) {
    %c0_i32 = arith.constant 0 : i32
    %c0_i32_0 = arith.constant 0 : i32
    %c0_i32_1 = arith.constant 0 : i32
    return %c0_i32, %c0_i32_0 : i32, i32
  }
  func.func @transform_18(%arg0: i32) -> (i32, i32) {
    %c0_i32 = arith.constant 0 : i32
    %c0_i32_0 = arith.constant 0 : i32
    %c0_i32_1 = arith.constant 0 : i32
    return %c0_i32, %c0_i32_0 : i32, i32
  }
  func.func @transform_19(%arg0: i32) -> (i32, i32) {
    %c0_i32 = arith.constant 0 : i32
    %c0_i32_0 = arith.constant 0 : i32
    %c0_i32_1 = arith.constant 0 : i32
    return %c0_i32, %c0_i32_0 : i32, i32
  }
  func.func @transform_20(%arg0: i32) -> (i32, i32) {
    %c0_i32 = arith.constant 0 : i32
    %c0_i32_0 = arith.constant 0 : i32
    %c0_i32_1 = arith.constant 0 : i32
    return %c0_i32, %c0_i32_0 : i32, i32
  }
  func.func @transform_21(%arg0: i32) -> (i32, i32) {
    %c0_i32 = arith.constant 0 : i32
    %c0_i32_0 = arith.constant 0 : i32
    %c0_i32_1 = arith.constant 0 : i32
    return %c0_i32, %c0_i32_0 : i32, i32
  }
  func.func @transform_22(%arg0: i32) -> (i32, i32) {
    %c0_i32 = arith.constant 0 : i32
    %c0_i32_0 = arith.constant 0 : i32
    %c0_i32_1 = arith.constant 0 : i32
    return %c0_i32, %c0_i32_0 : i32, i32
  }
}

</mosaic_0001>

<bundles_post_ra>
// kernel: bert_cls_forward.1
= control target key start
LH: loop header
LB: loop body
LE: loop exit
PB: predicated region body
PF: predicated region fallthrough
CT: control target
= control target key end

     0   :  { %s2513_s0 = inlined_call_operand.vmem [shape: f32[16,32], index: 0, kind: input, shape index: {}]   ;;  %s2514_s1 = inlined_call_operand.vmem [shape: f32[64,64], index: 1, kind: input, shape index: {}]   ;;  %s2515_s2 = inlined_call_operand.vmem [shape: f32[1,32], index: 2, kind: input, shape index: {}]   ;;  %s2516_s3 = inlined_call_operand.vmem [shape: f32[1,32], index: 3, kind: input, shape index: {}]   ;;  %s2517_s4 = inlined_call_operand.vmem [shape: bf16[2,32,96], index: 4, kind: input, shape index: {}]   ;;  %s2518_s5 = inlined_call_operand.vmem [shape: f32[2,1,96], index: 5, kind: input, shape index: {}]   ;;  %s2519_s6 = inlined_call_operand.vmem [shape: bf16[2,4,8,32], index: 6, kind: input, shape index: {}]   ;;  %s2520_s7 = inlined_call_operand.vmem [shape: f32[2,1,32], index: 7, kind: input, shape index: {}]   ;;  %s2521_s8 = inlined_call_operand.vmem [shape: f32[2,1,32], index: 8, kind: input, shape index: {}]   ;;  %s2522_s9 = inlined_call_operand.vmem [shape: f32[2,1,32], index: 9, kind: input, shape index: {}]   ;;  %s2523_s10 = inlined_call_operand.vmem [shape: bf16[2,32,64], index: 10, kind: input, shape index: {}]   ;;  %s2524_s11 = inlined_call_operand.vmem [shape: f32[2,1,64], index: 11, kind: input, shape index: {}]   ;;  %s2525_s12 = inlined_call_operand.vmem [shape: bf16[2,64,32], index: 12, kind: input, shape index: {}]   ;;  %s2526_s13 = inlined_call_operand.vmem [shape: f32[2,1,32], index: 13, kind: input, shape index: {}]   ;;  %s2527_s14 = inlined_call_operand.vmem [shape: f32[2,1,32], index: 14, kind: input, shape index: {}]   ;;  %s2528_s15 = inlined_call_operand.vmem [shape: f32[2,1,32], index: 15, kind: input, shape index: {}]   ;;  %s2529_s16 = inlined_call_operand.vmem [shape: bf16[32,32], index: 16, kind: input, shape index: {}]   ;;  %s2530_s17 = inlined_call_operand.vmem [shape: f32[1,32], index: 17, kind: input, shape index: {}]   ;;  %s2531_s18 = inlined_call_operand.vmem [shape: f32[1,32], index: 18, kind: input, shape index: {}]   ;;  %s2532_s19 = inlined_call_operand.vmem [shape: f32[1,32], index: 19, kind: input, shape index: {}]   ;;  %s2533_s20 = inlined_call_operand.vmem [shape: bf16[32,128], index: 20, kind: input, shape index: {}]   ;;  %s2534_s21 = inlined_call_operand.vmem [shape: f32[1,128], index: 21, kind: input, shape index: {}]   ;;  %s2535_s22 = inlined_call_operand.hbm [shape: f32[2,128], index: 22, kind: output, shape index: {}]  }
   0x1   :  { %2540 = sst [smem:[#allocation7_spill]] %s2513_s0 }
   0x2   :  { %2541 = sst [smem:[#allocation8_spill]] %s2514_s1 }
   0x3   :  { %2542 = sst [smem:[#allocation9_spill]] %s2515_s2 }
   0x4   :  { %2543 = sst [smem:[#allocation10_spill]] %s2516_s3 }
   0x5   :  { %2544 = sst [smem:[#allocation11_spill]] %s2517_s4 }
   0x6   :  { %2545 = sst [smem:[#allocation12_spill]] %s2518_s5 }
   0x7   :  { %2546 = sst [smem:[#allocation13_spill]] %s2519_s6 }
   0x8   :  { %2547 = sst [smem:[#allocation14_spill]] %s2530_s17 }
   0x9   :  { %2548 = sst [smem:[#allocation15_spill]] %s2531_s18 }
   0xa   :  { %2549 = sst [smem:[#allocation16_spill]] %s2532_s19 }
   0xb   :  { %2550 = sst [smem:[#allocation17_spill]] %s2533_s20 }
   0xc   :  { %2551 = sst [smem:[#allocation18_spill]] %s2534_s21 }
   0xd   :  { %2552 = sst [smem:[#allocation19_spill]] %s2535_s22 }
   0xe   :  { %27 = vsyncpa [#allocation4], 0  ;;  %s2216_s3 = smov 0  }
   0xf LB: > { %2553 = sst [smem:[#allocation6_spill]] %s2091_s3  ;;  %s2222_s28 = sadd.s32 4294967295, %s2091_s3   ;;  %s2091_s3 = sphi %s2216_s3, %s33_s3  }
  0x10   : > { %p1843_p0 = scmp.ge.s32.totalorder %s2091_s3, 1  ;;  %p702_p1 = scmp.lt.s32.totalorder %s2091_s3, 3 }
  0x12   : > { %p703_p2 = pnand %p1843_p0, %p702_p1 }
  0x13   : > { %p798_p3 = scmp.lt.s32.totalorder (!%p703_p2), %s2222_s28, 1  ;;  %s2555_s6 = sld [smem:[#allocation11_spill]] (!%p703_p2) }
  0x14   : > { %706 = sbr.rel (%p703_p2) target bundleno = 2910 (0xb5e), region = 108  ;;  %s2556_s27 = sld [smem:[#allocation13_spill]] (!%p703_p2) }
  0x15   : > { %p1852_p4 = scmp.ne.s32.totalorder (!%p703_p2), %s2222_s28, 0 }
  0x19   : > { %s2228_s29 = scalar_select %p798_p3, %s2222_s28, 1 }
  0x1a   : > { %s2557_s21 = sld [smem:[#allocation7_spill]] (!%p1852_p4) }
  0x1b   : > { %s1926_s30 = sshll.u32 %s2228_s29, 4  ;;  %s1929_s1 = sshll.u32 %s2228_s29, 5 }
  0x1c   : > { %s2238_s25 = scalar_lea.vmem %s2555_s6, %s1926_s30  ;;  %s2243_s3 = scalar_lea.vmem %s2556_s27, %s1926_s30 }
  0x1d   : > { %s2260_s6 = scalar_lea.vmem %s2523_s10, %s1926_s30  ;;  %s827_s27 = scalar_lea.vmem %s2524_s11, %s2228_s29 }
  0x1e   : > { %s2270_s19 = scalar_lea.vmem %s2525_s12, %s1929_s1  ;;  %s835_s4 = scalar_lea.vmem %s2526_s13, %s2228_s29 }
  0x1f   : > { %s838_s5 = scalar_lea.vmem %s2527_s14, %s2228_s29  ;;  %s841_s17 = scalar_lea.vmem %s2528_s15, %s2228_s29 }
  0x20   : > { %846 = sbr.rel (%p1852_p4) target bundleno = 315 (0x13b), region = 112  ;;  %s2558_s20 = sld [smem:[#allocation9_spill]] (!%p1852_p4) }
  0x21   : > { %s2559_s24 = sld [smem:[#allocation10_spill]] (!%p1852_p4) }
  0x25   : > { %v847_v0 = vld [vmem:[%s2557_s21] sm:$0xff]  ;;  %vm851_vm0 = vcmask 261120   ;;  %v848_v2 = vld [vmem:[%s2557_s21 + $0x8] sm:$0xff]  ;;  %v2093_v4 = vmov 32.0  }
  0x26   : > { %v852_v1 = vsel %vm851_vm0, %v847_v0, 0.0  ;;  %v855_v3 = vsel %vm851_vm0, %v848_v2, 0.0  ;;  %1970 = vrcp.f32 %v2093_v4  ;;  %v1968_v35 = vld [vmem:[%s2558_s20] ss:$0 sm:$0xff] }
  0x27   : > { %853 = vadd.xlane.f32.xlu0 %v852_v1  ;;  %v1969_v38 = vld [vmem:[%s2559_s24] ss:$0 sm:$0xff] }
  0x2c   : > { %v1971_v5 = vpop.eup %1970 }
  0x2d   : > { %v859_v6 = vmul.f32 32.0, %v1971_v5  ;;  %vm863_vm1 = vweird.f32 %v1971_v5 }
  0x2f   : > { %856 = vadd.xlane.f32.xlu0 %v855_v3  ;;  %v860_v7 = vsub.f32 1.0, %v859_v6 }
  0x31   : > { %v861_v8 = vmul.f32 %v1971_v5, %v860_v7 }
  0x33   : > { %v862_v9 = vadd.f32 %v1971_v5, %v861_v8 }
  0x35   : > { %v864_v10 = vsel %vm863_vm1, %v1971_v5, %v862_v9 }
  0x9a   : > { %v854_v11 = vpop.xlane.xlu0 %853 }
  0x9b   : > { %v865_v12 = vmul.f32 %v864_v10, %v854_v11 }
  0x9d   : > { %v867_v13 = vsub.f32 %v847_v0, %v865_v12 }
  0x9f   : > { %v869_v14 = vmul.f32 %v867_v13, %v867_v13 }
  0xa1   : > { %v871_v15 = vsel %vm851_vm0, %v869_v14, 0.0 }
  0xa2   : > { %872 = vadd.xlane.f32.xlu1 %v871_v15  ;;  %v857_v16 = vpop.xlane.xlu0 %856 }
  0xa3   : > { %v866_v17 = vmul.f32 %v864_v10, %v857_v16 }
  0xa5   : > { %v868_v18 = vsub.f32 %v848_v2, %v866_v17 }
  0xa7   : > { %v870_v19 = vmul.f32 %v868_v18, %v868_v18 }
  0xa9   : > { %v874_v20 = vsel %vm851_vm0, %v870_v19, 0.0 }
  0xaa   : > { %875 = vadd.xlane.f32.xlu1 %v874_v20 }
 0x115   : > { %v873_v21 = vpop.xlane.xlu1 %872 }
 0x116   : > { %v877_v22 = vmul.f32 %v873_v21, %v864_v10 }
 0x118   : > { %v879_v23 = vadd.f32 1e-12, %v877_v22 }
 0x11a   : > { %1972 = vrsqrt.f32 %v879_v23  ;;  %vm887_vm3 = vweird.f32 %v879_v23 }
 0x11d   : > { %v876_v24 = vpop.xlane.xlu1 %875 }
 0x11e   : > { %v878_v25 = vmul.f32 %v876_v24, %v864_v10 }
 0x120   : > { %v1973_v26 = vpop.eup %1972  ;;  %v880_v27 = vadd.f32 1e-12, %v878_v25 }
 0x121   : > { %v882_v28 = vmul.f32 %v1973_v26, %v879_v23  ;;  %vm888_vm2 = vweird.f32 %v1973_v26 }
 0x122   : > { %1974 = vrsqrt.f32 %v880_v27  ;;  %vm889_vm4 = vmor %vm887_vm3, %vm888_vm2  ;;  %vm897_vm6 = vweird.f32 %v880_v27 }
 0x123   : > { %v883_v29 = vmul.f32 %v1973_v26, %v882_v28 }
 0x125   : > { %v884_v30 = vmul.f32 0.5, %v883_v29 }
 0x127   : > { %v885_v31 = vsub.f32 1.5, %v884_v30 }
 0x128   : > { %v1975_v32 = vpop.eup %1974 }
 0x129   : > { %v886_v33 = vmul.f32 %v1973_v26, %v885_v31  ;;  %v892_v34 = vmul.f32 %v1975_v32, %v880_v27  ;;  %vm898_vm5 = vweird.f32 %v1975_v32 }
 0x12a   : > { %vm899_vm7 = vmor %vm897_vm6, %vm898_vm5 }
 0x12b   : > { %v890_v36 = vsel %vm889_vm4, %v1973_v26, %v886_v33  ;;  %v893_v37 = vmul.f32 %v1975_v32, %v892_v34 }
 0x12c   : > { %v901_v39 = vmul.f32 %v890_v36, %v867_v13 }
 0x12d   : > { %v894_v40 = vmul.f32 0.5, %v893_v37 }
 0x12e   : > { %v906_v41 = vmul.f32 %v1968_v35, %v901_v39 }
 0x12f   : > { %v895_v42 = vsub.f32 1.5, %v894_v40 }
 0x130   : > { %v911_v43 = vadd.f32 %v1969_v38, %v906_v41 }
 0x131   : > { %v896_v44 = vmul.f32 %v1975_v32, %v895_v42 }
 0x132   : > { %913 = vst.msk [vmem:[#allocation2] sm:$0xff] %vm851_vm0, %v911_v43 }
 0x133   : > { %v900_v45 = vsel %vm899_vm7, %v1975_v32, %v896_v44 }
 0x134   : > { %v902_v46 = vmul.f32 %v900_v45, %v868_v18 }
 0x136   : > { %v907_v47 = vmul.f32 %v1968_v35, %v902_v46 }
 0x138   : > { %v912_v48 = vadd.f32 %v1969_v38, %v907_v47 }
 0x13a   : > { %914 = vst.msk [vmem:[#allocation2 + $0x8] sm:$0xff] %vm851_vm0, %v912_v48 }
 0x13b PF: > { %v1931_v49 = vld [vmem:[%s2238_s25 + $0x8] sm:$0xff]  ;;  %v1930_v50 = vld [vmem:[%s2238_s25] sm:$0xff]  ;;  %vm938_vm8 = vcmask 261120   ;;  %s2560_s1 = sld [smem:[#allocation12_spill]]  ;;  %s2094_s25 = smov 120   ;;  %vm1000_vm9 = vcmask 64512  }
 0x13c   : > { %v2305_v51 = vld [vmem:[#allocation2] sm:$0xff]  ;;  %948 = vmatpush.bf16.msra.mxu0 %v1931_v49  ;;  %s2095_s23 = smov 104   ;;  %s2096_s18 = smov 112   ;;  %vm1054_vm10 = vcmask 523264   ;;  %vm1218_vm11 = vcmask 1043456  }
 0x13d   : > { %s2097_s20 = smov 96   ;;  %s2098_s0 = smov 64  }
 0x13e   : > { %s2562_s26 = sld [smem:[#allocation8_spill]]  ;;  %s2564_s30 = scalar_lea.vmem %s2521_s8, %s2228_s29 }
 0x13f   : > { %p1903_p5 = scmp.ne.s32.totalorder %s2222_s28, 1 }
 0x140   : > { %949 = vmatpush.bf16.msra.mxu0 %v1930_v50 }
 0x141   : > { %v2307_v52 = vld [vmem:[#allocation2 + $0x8] sm:$0xff]  ;;  %s2561_s22 = scalar_lea.vmem %s2560_s1, %s2228_s29  ;;  %s2565_s1 = scalar_lea.vmem %s2522_s9, %s2228_s29 }
 0x142   : > { %v917_v53 = vpack.c.bf16 %v2307_v52, %v2305_v51  ;;  %v1991_v55 = vld [vmem:[%s2561_s22] ss:$0 sm:$0xff] }
 0x144   : > { %1861 = vmatmul.msk.bf16.vlgmr.msra.gmra.mxu0 %vm938_vm8, %v917_v53  ;;  %v980_v18 = vld [vmem:[%s2562_s26] sm:$0xff]  ;;  %v982_v19 = vld [vmem:[%s2562_s26 + $0x10] sm:$0xff]  ;;  %v981_v26 = vld [vmem:[%s2562_s26 + $0x8] sm:$0xff] }
 0x145   : > { %v983_v31 = vld [vmem:[%s2562_s26 + $0x18] sm:$0xff]  ;;  %v984_v32 = vld [vmem:[%s2562_s26 + $0x20] sm:$0xff]  ;;  %v985_v38 = vld [vmem:[%s2562_s26 + $0x28] sm:$0xff] }
 0x146   : > { %v986_v42 = vld [vmem:[%s2562_s26 + $0x30] sm:$0xff]  ;;  %v987_v46 = vld [vmem:[%s2562_s26 + $0x38] sm:$0xff] }
 0x1c1   : > { %v951_v54 = vpop.f32.mrf.mxu0 }
 0x1c2   : > { %v952_v57 = vadd.f32 %v1991_v55, %v951_v54 }
 0x1c9   : > { %v953_v56 = vpop.f32.mrf.mxu0 }
 0x1ca   : > { %v954_v58 = vadd.f32 %v1991_v55, %v953_v56 }
 0x1cc   : > { %v1986_v59 = vpack.i.bf16 %v954_v58, %v952_v57  ;;  %v2317_v60 = vpack.c.bf16 %v954_v58, %v952_v57 }
 0x1ce   : > { %1987 = vrot.lane.b32.xlu1 %v1986_v59, %s2094_s25  ;;  %1977 = vrot.lane.b32.xlu0 %v1986_v59, %s2095_s23 }
 0x1d6   : > { %1982 = vrot.lane.b32.xlu0 %v1986_v59, %s2096_s18  ;;  %s2563_s18 = scalar_lea.vmem %s2520_s7, %s2228_s29 }
 0x1de   : > { %992 = vrot.lane.b32.xlu0 %v2317_v60, %s2097_s20 }
 0x240   : > { %v1978_v61 = vpop.permute.xlu0 %1977  ;;  %v1988_v5 = vpop.permute.xlu1 %1987 }
 0x241   : > { %v1980_v62 = vunpack.i.h.bf16 %v1978_v61  ;;  %v1979_v63 = vunpack.i.l.bf16 %v1978_v61  ;;  %v1990_v6 = vunpack.i.h.bf16 %v1988_v5  ;;  %v1989_v7 = vunpack.i.l.bf16 %v1988_v5 }
 0x243   : > { %v979_v0 = vpack.c.bf16 %v1980_v62, %v1979_v63  ;;  %v2323_v8 = vpack.c.bf16 %v1990_v6, %v1989_v7 }
 0x245   : > { %998 = vrot.lane.b32.xlu1 %v979_v0, %s2097_s20 }
 0x248   : > { %v1983_v1 = vpop.permute.xlu0 %1982 }
 0x249   : > { %v1985_v2 = vunpack.i.h.bf16 %v1983_v1  ;;  %v1984_v3 = vunpack.i.l.bf16 %v1983_v1 }
 0x24b   : > { %v2320_v4 = vpack.c.bf16 %v1985_v2, %v1984_v3 }
 0x24d   : > { %996 = vrot.lane.b32.xlu2 %v2320_v4, %s2097_s20 }
 0x250   : > { %v993_v16 = vpop.permute.xlu0 %992 }
 0x251   : > { %v1014_v17 = vsel %vm1000_vm9, %v993_v16, 0 }
 0x255   : > { %994 = vrot.lane.b32.xlu2 %v2323_v8, %s2097_s20 }
 0x25d   : > { %1153 = vrot.lane.b32.xlu2 %v979_v0, %s2098_s0 }
 0x2a7   : > { %v997_v9 = vpop.permute.xlu2 %996 }
 0x2a8   : > { %v1020_v14 = vsel %vm1000_vm9, %v997_v9, 0 }
 0x2af   : > { %v995_v10 = vpop.permute.xlu2 %994 }
 0x2b0   : > { %v1017_v15 = vsel %vm1000_vm9, %v995_v10, 0 }
 0x2b7   : > { %v1154_v11 = vpop.permute.xlu2 %1153  ;;  %v999_v12 = vpop.permute.xlu1 %998 }
 0x2b8   : > { %1175 = vmatpush.bf16.msra.mxu2 %v1154_v11  ;;  %v1023_v13 = vsel %vm1000_vm9, %v999_v12, 0 }
 0x2b9   : > { %1029 = vmatpush.bf16.xpose.msrb.mxu0 %v1023_v13  ;;  %1942 = vmatpush.bf16.xpose.msra.mxu1 %v1023_v13 }
 0x2c1   : > { %1030 = vmatpush.bf16.xpose.msrb.mxu0 %v1020_v14  ;;  %1943 = vmatpush.bf16.xpose.msra.mxu1 %v1020_v14 }
 0x2c9   : > { %1031 = vmatpush.bf16.xpose.msrb.mxu0 %v1017_v15  ;;  %1944 = vmatpush.bf16.xpose.msra.mxu1 %v1017_v15 }
 0x2d1   : > { %1032 = vmatpush.bf16.xpose.msrb.mxu0 %v1014_v17  ;;  %1945 = vmatpush.bf16.xpose.msra.mxu1 %v1014_v17 }
 0x2d8   : > { %1862 = vmatmul.msk.bf16.vlgmr.msrb.gmra.mxu0 %vm1000_vm9, %v2317_v60  ;;  %1863 = vmatmul.msk.bf16.vlgmr.msra.gmra.mxu1 %vm1000_vm9, %v2323_v8 }
 0x2e8   : > { %1864 = vmatmul.msk.bf16.gmra.mxu1 %vm1000_vm9, %v2320_v4 }
 0x2f8   : > { %1865 = vmatmul.msk.bf16.gmra.mxu1 %vm1000_vm9, %v979_v0 }
 0x355   : > { %v1034_v20 = vpop.f32.mrf.mxu0  ;;  %v1039_v21 = vpop.f32.mrf.mxu1 }
 0x356   : > { %v1035_v22 = vadd.f32 %v1034_v20, %v980_v18  ;;  %v2344_v23 = vadd.f32 %v1039_v21, %v982_v19 }
 0x358   : > { %v1061_v24 = vsel %vm1054_vm10, %v2344_v23, -inf  ;;  %v1055_v25 = vsel %vm1054_vm10, %v1035_v22, -inf }
 0x359   : > { %1062 = vmax.xlane.f32.xlu0 %v1061_v24  ;;  %1056 = vmax.xlane.f32.xlu1 %v1055_v25 }
 0x35d   : > { %v1036_v27 = vpop.f32.mrf.mxu0  ;;  %v1041_v28 = vpop.f32.mrf.mxu1 }
 0x35e   : > { %v1037_v29 = vadd.f32 %v1036_v27, %v981_v26  ;;  %v1042_v33 = vadd.f32 %v1041_v28, %v983_v31 }
 0x360   : > { %v1058_v30 = vsel %vm1054_vm10, %v1037_v29, -inf  ;;  %v1064_v36 = vsel %vm1054_vm10, %v1042_v33, -inf }
 0x361   : > { %1059 = vmax.xlane.f32.xlu2 %v1058_v30 }
 0x365   : > { %v1044_v34 = vpop.f32.mrf.mxu1 }
 0x366   : > { %v1045_v35 = vadd.f32 %v1044_v34, %v984_v32 }
 0x368   : > { %v1067_v37 = vsel %vm1054_vm10, %v1045_v35, -inf }
 0x369   : > { %1065 = vmax.xlane.f32.xlu2 %v1064_v36  ;;  %1068 = vmax.xlane.f32.xlu1 %v1067_v37 }
 0x36d   : > { %v1046_v39 = vpop.f32.mrf.mxu1 }
 0x36e   : > { %v1047_v40 = vadd.f32 %v1046_v39, %v985_v38 }
 0x370   : > { %v1070_v41 = vsel %vm1054_vm10, %v1047_v40, -inf }
 0x371   : > { %1071 = vmax.xlane.f32.xlu2 %v1070_v41 }
 0x375   : > { %v1049_v43 = vpop.f32.mrf.mxu1 }
 0x376   : > { %v1050_v44 = vadd.f32 %v1049_v43, %v986_v42 }
 0x378   : > { %v1073_v45 = vsel %vm1054_vm10, %v1050_v44, -inf }
 0x379   : > { %1074 = vmax.xlane.f32.xlu0 %v1073_v45 }
 0x37d   : > { %v1051_v47 = vpop.f32.mrf.mxu1 }
 0x37e   : > { %v1052_v48 = vadd.f32 %v1051_v47, %v987_v46 }
 0x380   : > { %v1076_v49 = vsel %vm1054_vm10, %v1052_v48, -inf }
 0x381   : > { %1077 = vmax.xlane.f32.xlu1 %v1076_v49 }
 0x389   : > { %1147 = vrot.lane.b32.xlu2 %v2317_v60, %s2098_s0 }
 0x3cc   : > { %v1057_v50 = vpop.xlane.xlu1 %1056  ;;  %v1063_v1 = vpop.xlane.xlu0 %1062 }
 0x3cd   : > { %v1079_v53 = vsub.f32 %v1035_v22, %v1057_v50  ;;  %v1081_v11 = vsub.f32 %v2344_v23, %v1063_v1 }
 0x3cf   : > { %v1087_v54 = vmul.f32 1.442695, %v1079_v53  ;;  %v1091_v12 = vmul.f32 1.442695, %v1081_v11 }
 0x3d1   : > { %1999 = vpow2.f32 %v1087_v54 }
 0x3d4   : > { %v1060_v55 = vpop.xlane.xlu2 %1059 }
 0x3d5   : > { %v1080_v56 = vsub.f32 %v1037_v29, %v1060_v55 }
 0x3d7   : > { %v1089_v57 = vmul.f32 1.442695, %v1080_v56  ;;  %v2375_v58 = vpop.eup %1999 }
 0x3d8   : > { %v1103_v59 = vsel %vm1054_vm10, %v2375_v58, 0.0 }
 0x3d9   : > { %2001 = vpow2.f32 %v1089_v57  ;;  %1104 = vadd.xlane.f32.xlu0 %v1103_v59 }
 0x3dc   : > { %v1066_v61 = vpop.xlane.xlu2 %1065  ;;  %v1069_v15 = vpop.xlane.xlu1 %1068 }
 0x3dd   : > { %v1082_v62 = vsub.f32 %v1042_v33, %v1066_v61  ;;  %v1083_v16 = vsub.f32 %v1045_v35, %v1069_v15 }
 0x3df   : > { %v2002_v63 = vpop.eup %2001  ;;  %v1093_v0 = vmul.f32 1.442695, %v1082_v62  ;;  %v1095_v18 = vmul.f32 1.442695, %v1083_v16  ;;  %v1209_v62 = vld [vmem:[%s2243_s3] sm:$0xf] }
 0x3e0   : > { %v1106_v60 = vsel %vm1054_vm10, %v2002_v63, 0.0  ;;  %v1875_v16 = vld [vmem:[%s2243_s3 + $0xc] sm:$0xf] }
 0x3e1   : > { %2003 = vpow2.f32 %v1093_v0  ;;  %1107 = vadd.xlane.f32.xlu1 %v1106_v60  ;;  %v1871_v0 = vld [vmem:[%s2243_s3 + $0x4] sm:$0xf] }
 0x3e2   : > { %v1252_v60 = vsel %vm1218_vm11, %v1871_v0, 0 }
 0x3e4   : > { %v1072_v13 = vpop.xlane.xlu2 %1071 }
 0x3e5   : > { %v1084_v14 = vsub.f32 %v1047_v40, %v1072_v13 }
 0x3e7   : > { %v2004_v2 = vpop.eup %2003 }
 0x3e8   : > { %v1112_v3 = vsel %vm1054_vm10, %v2004_v2, 0.0 }
 0x3e9   : > { %1113 = vadd.xlane.f32.xlu2 %v1112_v3 }
 0x3ec   : > { %v1075_v5 = vpop.xlane.xlu0 %1074  ;;  %v1148_v35 = vpop.permute.xlu2 %1147 }
 0x3ed   : > { %v1085_v6 = vsub.f32 %v1050_v44, %v1075_v5  ;;  %1151 = vrot.lane.b32.xlu0 %v2320_v4, %s2098_s0  ;;  %v1097_v4 = vmul.f32 1.442695, %v1084_v14 }
 0x3ef   : > { %v1099_v7 = vmul.f32 1.442695, %v1085_v6 }
 0x3f1   : > { %2005 = vpow2.f32 %v1099_v7 }
 0x3f2   : > { %2007 = vpow2.f32 %v1091_v12 }
 0x3f3   : > { %2009 = vpow2.f32 %v1097_v4 }
 0x3f4   : > { %v1078_v19 = vpop.xlane.xlu1 %1077  ;;  %2011 = vpow2.f32 %v1095_v18 }
 0x3f5   : > { %v1086_v21 = vsub.f32 %v1052_v48, %v1078_v19  ;;  %v1310_v19 = vsel %vm1218_vm11, %v1875_v16, 0 }
 0x3f7   : > { %v2383_v9 = vpop.eup %2005 }
 0x3f8   : > { %v1121_v10 = vsel %vm1054_vm10, %v2383_v9, 0.0  ;;  %v2008_v17 = vpop.eup %2007 }
 0x3f9   : > { %1122 = vadd.xlane.f32.xlu2 %v1121_v10  ;;  %v1109_v20 = vsel %vm1054_vm10, %v2008_v17, 0.0  ;;  %v2010_v22 = vpop.eup %2009  ;;  %v1873_v10 = vld [vmem:[%s2243_s3 + $0x8] sm:$0xf] }
 0x3fa   : > { %1149 = vrot.lane.b32.xlu1 %v2323_v8, %s2098_s0  ;;  %v1101_v8 = vmul.f32 1.442695, %v1086_v21  ;;  %v1118_v23 = vsel %vm1054_vm10, %v2010_v22, 0.0  ;;  %v2012_v24 = vpop.eup %2011  ;;  %v1281_v11 = vsel %vm1218_vm11, %v1873_v10, 0  ;;  %s2569_s0 = sld [smem:[#allocation16_spill]] (!%p1903_p5) }
 0x3fb   : > { %v1115_v25 = vsel %vm1054_vm10, %v2012_v24, 0.0 }
 0x3fc   : > { %2013 = vpow2.f32 %v1101_v8 }
 0x402   : > { %v2014_v26 = vpop.eup %2013 }
 0x403   : > { %v1124_v27 = vsel %vm1054_vm10, %v2014_v26, 0.0 }
 0x417   : > { %1110 = vadd.xlane.f32.xlu0 %v1109_v20 }
 0x41f   : > { %1119 = vadd.xlane.f32.xlu0 %v1118_v23 }
 0x424   : > { %1116 = vadd.xlane.f32.xlu1 %v1115_v25 }
 0x42c   : > { %1125 = vadd.xlane.f32.xlu1 %v1124_v27 }
 0x44c   : > { %v1105_v28 = vpop.xlane.xlu0 %1104 }
 0x454   : > { %v1108_v30 = vpop.xlane.xlu1 %1107 }
 0x455   : > { %2015 = vrcp.f32 %v1108_v30 }
 0x456   : > { %2017 = vrcp.f32 %v1105_v28 }
 0x45b   : > { %v2016_v31 = vpop.eup %2015 }
 0x45c   : > { %v2018_v33 = vpop.eup %2017  ;;  %v1136_v34 = vmul.f32 %v2016_v31, %v2002_v63  ;;  %v1114_v38 = vpop.xlane.xlu2 %1113  ;;  %v1220_v63 = vsel %vm1218_vm11, %v1209_v62, 0 }
 0x45d   : > { %v1135_v36 = vmul.f32 %v2018_v33, %v2375_v58  ;;  %2019 = vrcp.f32 %v1114_v38  ;;  %1229 = vmatpush.bf16.msra.mxu3 %v1220_v63  ;;  %v1992_v38 = vld [vmem:[%s2563_s18] ss:$0 sm:$0xff] }
 0x45f   : > { %v1152_v29 = vpop.permute.xlu0 %1151  ;;  %v1143_v37 = vpack.c.bf16 %v1136_v34, %v1135_v36 }
 0x460   : > { %1176 = vmatpush.bf16.msra.mxu2 %v1152_v29 }
 0x461   : > { %1261 = vmatpush.bf16.msrb.mxu3 %v1252_v60 }
 0x463   : > { %v2020_v40 = vpop.eup %2019 }
 0x464   : > { %v1138_v43 = vmul.f32 %v2020_v40, %v2004_v2 }
 0x46c   : > { %v1150_v32 = vpop.permute.xlu1 %1149  ;;  %v1123_v55 = vpop.xlane.xlu2 %1122 }
 0x46d   : > { %1177 = vmatpush.bf16.msra.mxu2 %v1150_v32 }
 0x471   : > { %1178 = vmatpush.bf16.msra.mxu2 %v1148_v35 }
 0x474   : > { %1866 = vmatmul.msk.bf16.vlgmr.msra.gmra.mxu2 %vm1054_vm10, %v1143_v37 }
 0x48a   : > { %v1111_v39 = vpop.xlane.xlu0 %1110 }
 0x48b   : > { %2021 = vrcp.f32 %v1111_v39 }
 0x491   : > { %v2022_v41 = vpop.eup %2021 }
 0x492   : > { %v1137_v42 = vmul.f32 %v2022_v41, %v2008_v17  ;;  %v1120_v45 = vpop.xlane.xlu0 %1119 }
 0x494   : > { %v1144_v44 = vpack.c.bf16 %v1138_v43, %v1137_v42 }
 0x496   : > { %1867 = vmatmul.msk.bf16.gmra.mxu2 %vm1054_vm10, %v1144_v44 }
 0x497   : > { %v1117_v46 = vpop.xlane.xlu1 %1116 }
 0x498   : > { %2023 = vrcp.f32 %v1117_v46 }
 0x499   : > { %2025 = vrcp.f32 %v1120_v45 }
 0x49e   : > { %v2024_v47 = vpop.eup %2023 }
 0x49f   : > { %v2026_v48 = vpop.eup %2025  ;;  %v1139_v49 = vmul.f32 %v2024_v47, %v2012_v24  ;;  %v1126_v53 = vpop.xlane.xlu1 %1125 }
 0x4a0   : > { %v1140_v50 = vmul.f32 %v2026_v48, %v2010_v22  ;;  %2027 = vrcp.f32 %v1126_v53 }
 0x4a1   : > { %2029 = vrcp.f32 %v1123_v55 }
 0x4a2   : > { %v1145_v54 = vpack.c.bf16 %v1140_v50, %v1139_v49 }
 0x4a6   : > { %1868 = vmatmul.msk.bf16.gmra.mxu2 %vm1054_vm10, %v1145_v54  ;;  %v2028_v56 = vpop.eup %2027 }
 0x4a7   : > { %v2030_v57 = vpop.eup %2029  ;;  %v1142_v58 = vmul.f32 %v2028_v56, %v2014_v26  ;;  %v2099_v56 = vmov 32.0  }
 0x4a8   : > { %v1141_v59 = vmul.f32 %v2030_v57, %v2383_v9  ;;  %2031 = vrcp.f32 %v2099_v56 }
 0x4aa   : > { %v1146_v61 = vpack.c.bf16 %v1142_v58, %v1141_v59 }
 0x4ae   : > { %v2032_v57 = vpop.eup %2031 }
 0x4af   : > { %v1339_v58 = vmul.f32 32.0, %v2032_v57  ;;  %vm1343_vm12 = vweird.f32 %v2032_v57 }
 0x4b1   : > { %v1340_v59 = vsub.f32 1.0, %v1339_v58 }
 0x4b6   : > { %1869 = vmatmul.msk.bf16.gmra.mxu2 %vm1054_vm10, %v1146_v61  ;;  %v1341_v61 = vmul.f32 %v2032_v57, %v1340_v59 }
 0x4f7   : > { %v1180_v1 = vpop.f32.mrf.mxu2 }
 0x4f8   : > { %v1200_v2 = vpack.c.bf16 %v1180_v1, %v1180_v1 }
 0x4fa   : > { %v1212_v6 = vunpack.c.l.b16 %v1200_v2 }
 0x4ff   : > { %v1182_v3 = vpop.f32.mrf.mxu2 }
 0x500   : > { %v1201_v5 = vpack.c.bf16 %v1182_v3, %v1182_v3 }
 0x502   : > { %v1213_v7 = vunpack.c.l.b16 %v1201_v5 }
 0x504   : > { %v1214_v9 = vpack.c.b16 %v1213_v7, %v1212_v6 }
 0x506   : > { %1870 = vmatmul.msk.bf16.vlgmr.msra.gmra.mxu3 %vm1000_vm9, %v1214_v9  ;;  %v1933_v9 = vld [vmem:[%s2260_s6 + $0x8] sm:$0xff] }
 0x507   : > { %1290 = vmatpush.bf16.msra.mxu3 %v1281_v11  ;;  %1423 = vmatpush.bf16.msra.mxu0 %v1933_v9 }
 0x519   : > { %v1185_v12 = vpop.f32.mrf.mxu2 }
 0x51a   : > { %v1202_v13 = vpack.c.bf16 %v1185_v12, %v1185_v12  ;;  %v1932_v12 = vld [vmem:[%s2260_s6] sm:$0xff] }
 0x51b   : > { %1424 = vmatpush.bf16.msra.mxu0 %v1932_v12 }
 0x51c   : > { %v1245_v4 = vunpack.c.l.b16 %v1202_v13 }
 0x521   : > { %v1187_v14 = vpop.f32.mrf.mxu2 }
 0x522   : > { %v1203_v15 = vpack.c.bf16 %v1187_v14, %v1187_v14 }
 0x524   : > { %v1246_v17 = vunpack.c.l.b16 %v1203_v15 }
 0x526   : > { %v1247_v18 = vpack.c.b16 %v1246_v17, %v1245_v4 }
 0x528   : > { %1872 = vmatmul.msk.bf16.vlgmr.msrb.gmra.mxu3 %vm1000_vm9, %v1247_v18 }
 0x529   : > { %v1190_v20 = vpop.f32.mrf.mxu2  ;;  %1319 = vmatpush.bf16.msrb.mxu3 %v1310_v19 }
 0x52a   : > { %v1204_v21 = vpack.c.bf16 %v1190_v20, %v1190_v20 }
 0x52c   : > { %v1274_v23 = vunpack.c.l.b16 %v1204_v21 }
 0x531   : > { %v1192_v22 = vpop.f32.mrf.mxu2 }
 0x532   : > { %v1205_v8 = vpack.c.bf16 %v1192_v22, %v1192_v22 }
 0x534   : > { %v1275_v24 = vunpack.c.l.b16 %v1205_v8 }
 0x536   : > { %v1276_v25 = vpack.c.b16 %v1275_v24, %v1274_v23 }
 0x538   : > { %1874 = vmatmul.msk.bf16.vlgmr.msra.gmra.mxu3 %vm1000_vm9, %v1276_v25 }
 0x539   : > { %v1195_v26 = vpop.f32.mrf.mxu2 }
 0x53a   : > { %v1206_v27 = vpack.c.bf16 %v1195_v26, %v1195_v26 }
 0x53c   : > { %v1303_v30 = vunpack.c.l.b16 %v1206_v27  ;;  %v1993_v27 = vld [vmem:[%s2564_s30] ss:$0 sm:$0xff]  ;;  %s2566_s30 = sld [smem:[#allocation14_spill]] (!%p1903_p5) }
 0x541   : > { %v1197_v28 = vpop.f32.mrf.mxu2 }
 0x542   : > { %v1207_v29 = vpack.c.bf16 %v1197_v28, %v1197_v28 }
 0x544   : > { %v1304_v31 = vunpack.c.l.b16 %v1207_v29 }
 0x546   : > { %v1305_v32 = vpack.c.b16 %v1304_v31, %v1303_v30  ;;  %v1994_v31 = vld [vmem:[%s2565_s1] ss:$0 sm:$0xff]  ;;  %s2567_s1 = sld [smem:[#allocation17_spill]] (!%p1903_p5) }
 0x548   : > { %1876 = vmatmul.msk.bf16.vlgmr.msrb.gmra.mxu3 %vm1000_vm9, %v1305_v32 }
 0x589   : > { %v1231_v33 = vpop.f32.mrf.mxu3 }
 0x58a   : > { %v1239_v40 = vadd.f32 %v1992_v38, %v1231_v33 }
 0x591   : > { %v1233_v34 = vpop.f32.mrf.mxu3 }
 0x592   : > { %v1240_v45 = vadd.f32 %v1992_v38, %v1233_v34  ;;  %v1937_v38 = vld [vmem:[%s2270_s19 + $0x18] sm:$0xff] }
 0x593   : > { %1493 = vmatpush.bf16.msra.mxu3 %v1937_v38 }
 0x5ab   : > { %v1263_v35 = vpop.f32.mrf.mxu3 }
 0x5ac   : > { %v1268_v41 = vadd.f32 %v1263_v35, %v1239_v40  ;;  %v1935_v40 = vld [vmem:[%s2270_s19 + $0x8] sm:$0xff] }
 0x5b3   : > { %v1265_v36 = vpop.f32.mrf.mxu3 }
 0x5b4   : > { %v1269_v47 = vadd.f32 %v1265_v36, %v1240_v45 }
 0x5bb   : > { %v1292_v37 = vpop.f32.mrf.mxu3 }
 0x5bc   : > { %v1297_v42 = vadd.f32 %v1292_v37, %v1268_v41  ;;  %v1934_v41 = vld [vmem:[%s2270_s19] sm:$0xff] }
 0x5c3   : > { %v1294_v39 = vpop.f32.mrf.mxu3 }
 0x5c4   : > { %v1298_v49 = vadd.f32 %v1294_v39, %v1269_v47  ;;  %v1936_v39 = vld [vmem:[%s2270_s19 + $0x10] sm:$0xff] }
 0x5c5   : > { %1494 = vmatpush.bf16.msra.mxu3 %v1936_v39  ;;  %v1998_v39 = vld [vmem:[%s841_s17] ss:$0 sm:$0xff] }
 0x5c9   : > { %1495 = vmatpush.bf16.msra.mxu3 %v1935_v40 }
 0x5cb   : > { %v1321_v43 = vpop.f32.mrf.mxu3 }
 0x5cc   : > { %v1326_v44 = vadd.f32 %v1321_v43, %v1297_v42  ;;  %v1995_v42 = vld [vmem:[%s827_s27] ss:$0 sm:$0xff] }
 0x5cd   : > { %1496 = vmatpush.bf16.msra.mxu3 %v1934_v41 }
 0x5ce   : > { %v1328_v46 = vadd.f32 %v1326_v44, %v2305_v51  ;;  %v1342_v51 = vadd.f32 %v2032_v57, %v1341_v61 }
 0x5d0   : > { %v1332_v48 = vsel %vm938_vm8, %v1328_v46, 0.0  ;;  %v2421_v62 = vsel %vm1343_vm12, %v2032_v57, %v1342_v51 }
 0x5d1   : > { %1333 = vadd.xlane.f32.xlu0 %v1332_v48 }
 0x5d3   : > { %v1323_v50 = vpop.f32.mrf.mxu3 }
 0x5d4   : > { %v1327_v53 = vadd.f32 %v1323_v50, %v1298_v49 }
 0x5d6   : > { %v1329_v54 = vadd.f32 %v1327_v53, %v2307_v52 }
 0x5d8   : > { %v1335_v55 = vsel %vm938_vm8, %v1329_v54, 0.0 }
 0x5d9   : > { %1336 = vadd.xlane.f32.xlu2 %v1335_v55 }
 0x644   : > { %v1334_v63 = vpop.xlane.xlu0 %1333 }
 0x645   : > { %v1345_v0 = vmul.f32 %v2421_v62, %v1334_v63 }
 0x647   : > { %v1347_v60 = vsub.f32 %v1328_v46, %v1345_v0 }
 0x649   : > { %v1349_v52 = vmul.f32 %v1347_v60, %v1347_v60 }
 0x64b   : > { %v1351_v1 = vsel %vm938_vm8, %v1349_v52, 0.0 }
 0x64c   : > { %1352 = vadd.xlane.f32.xlu1 %v1351_v1  ;;  %v1337_v2 = vpop.xlane.xlu2 %1336 }
 0x64d   : > { %v1346_v3 = vmul.f32 %v2421_v62, %v1337_v2 }
 0x64f   : > { %v1348_v5 = vsub.f32 %v1329_v54, %v1346_v3  ;;  %v1996_v3 = vld [vmem:[%s835_s4] ss:$0 sm:$0xff]  ;;  %s2568_s4 = sld [smem:[#allocation15_spill]] (!%p1903_p5) }
 0x651   : > { %v1350_v6 = vmul.f32 %v1348_v5, %v1348_v5 }
 0x653   : > { %v1354_v7 = vsel %vm938_vm8, %v1350_v6, 0.0 }
 0x654   : > { %1355 = vadd.xlane.f32.xlu0 %v1354_v7 }
 0x6bf   : > { %v1353_v10 = vpop.xlane.xlu1 %1352 }
 0x6c0   : > { %v1357_v11 = vmul.f32 %v1353_v10, %v2421_v62 }
 0x6c2   : > { %v1359_v13 = vadd.f32 1e-12, %v1357_v11 }
 0x6c4   : > { %2033 = vrsqrt.f32 %v1359_v13  ;;  %vm1367_vm14 = vweird.f32 %v1359_v13 }
 0x6c7   : > { %v1356_v14 = vpop.xlane.xlu0 %1355 }
 0x6c8   : > { %v1358_v15 = vmul.f32 %v1356_v14, %v2421_v62 }
 0x6ca   : > { %v2034_v16 = vpop.eup %2033  ;;  %v1360_v4 = vadd.f32 1e-12, %v1358_v15 }
 0x6cb   : > { %v1362_v17 = vmul.f32 %v2034_v16, %v1359_v13  ;;  %vm1368_vm13 = vweird.f32 %v2034_v16 }
 0x6cc   : > { %2035 = vrsqrt.f32 %v1360_v4  ;;  %vm1369_vm15 = vmor %vm1367_vm14, %vm1368_vm13  ;;  %vm1377_vm1 = vweird.f32 %v1360_v4 }
 0x6cd   : > { %v1363_v18 = vmul.f32 %v2034_v16, %v1362_v17 }
 0x6cf   : > { %v1364_v19 = vmul.f32 0.5, %v1363_v18 }
 0x6d1   : > { %v1365_v20 = vsub.f32 1.5, %v1364_v19 }
 0x6d2   : > { %v2036_v21 = vpop.eup %2035 }
 0x6d3   : > { %v1366_v22 = vmul.f32 %v2034_v16, %v1365_v20  ;;  %v1372_v8 = vmul.f32 %v2036_v21, %v1360_v4  ;;  %vm1378_vm0 = vweird.f32 %v2036_v21 }
 0x6d4   : > { %vm1379_vm2 = vmor %vm1377_vm1, %vm1378_vm0 }
 0x6d5   : > { %v1373_v23 = vmul.f32 %v2036_v21, %v1372_v8  ;;  %v1370_v24 = vsel %vm1369_vm15, %v2034_v16, %v1366_v22 }
 0x6d6   : > { %v1381_v28 = vmul.f32 %v1370_v24, %v1347_v60 }
 0x6d7   : > { %v1374_v25 = vmul.f32 0.5, %v1373_v23 }
 0x6d8   : > { %v1386_v32 = vmul.f32 %v1993_v27, %v1381_v28 }
 0x6d9   : > { %v1375_v26 = vsub.f32 1.5, %v1374_v25 }
 0x6da   : > { %v1391_v35 = vadd.f32 %v1994_v31, %v1386_v32 }
 0x6db   : > { %v1376_v29 = vmul.f32 %v2036_v21, %v1375_v26 }
 0x6dd   : > { %v1380_v30 = vsel %vm1379_vm2, %v2036_v21, %v1376_v29 }
 0x6de   : > { %v1382_v33 = vmul.f32 %v1380_v30, %v1348_v5 }
 0x6e0   : > { %v1387_v34 = vmul.f32 %v1993_v27, %v1382_v33 }
 0x6e2   : > { %v1392_v36 = vadd.f32 %v1994_v31, %v1387_v34 }
 0x6e4   : > { %v1393_v37 = vpack.c.bf16 %v1392_v36, %v1391_v35 }
 0x6e6   : > { %1885 = vmatmul.msk.bf16.vlgmr.msra.gmra.mxu0 %vm938_vm8, %v1393_v37 }
 0x763   : > { %v1426_v43 = vpop.f32.mrf.mxu0 }
 0x764   : > { %v1427_v44 = vadd.f32 %v1995_v42, %v1426_v43 }
 0x766   : > { %v1433_v45 = vmul.f32 0.044715, %v1427_v44  ;;  %v1431_v63 = vmul.f32 0.5, %v1427_v44 }
 0x768   : > { %v1435_v46 = vmul.f32 %v1433_v45, %v1427_v44 }
 0x76a   : > { %v1437_v47 = vmul.f32 %v1435_v46, %v1427_v44 }
 0x76b   : > { %v1428_v48 = vpop.f32.mrf.mxu0 }
 0x76c   : > { %v1439_v49 = vadd.f32 %v1437_v47, %v1427_v44  ;;  %v1429_v50 = vadd.f32 %v1995_v42, %v1428_v48 }
 0x76e   : > { %v1434_v53 = vmul.f32 0.044715, %v1429_v50  ;;  %v1441_v54 = vmul.f32 0.7978846, %v1439_v49  ;;  %v1432_v0 = vmul.f32 0.5, %v1429_v50 }
 0x770   : > { %v1436_v55 = vmul.f32 %v1434_v53, %v1429_v50  ;;  %2037 = vtanh.f32 %v1441_v54 }
 0x772   : > { %v1438_v56 = vmul.f32 %v1436_v55, %v1429_v50 }
 0x774   : > { %v1440_v57 = vadd.f32 %v1438_v56, %v1429_v50 }
 0x776   : > { %v1442_v58 = vmul.f32 0.7978846, %v1440_v57  ;;  %v2038_v59 = vpop.eup %2037 }
 0x777   : > { %v1445_v61 = vadd.f32 1.0, %v2038_v59 }
 0x778   : > { %2039 = vtanh.f32 %v1442_v58 }
 0x779   : > { %v1447_v52 = vmul.f32 %v1445_v61, %v1431_v63 }
 0x77e   : > { %v2040_v51 = vpop.eup %2039 }
 0x77f   : > { %v1446_v60 = vadd.f32 1.0, %v2040_v51 }
 0x781   : > { %v1448_v1 = vmul.f32 %v1446_v60, %v1432_v0 }
 0x783   : > { %v1449_v2 = vpack.c.bf16 %v1448_v1, %v1447_v52 }
 0x785   : > { %1902 = vmatmul.msk.bf16.vlgmr.msra.gmra.mxu3 %vm1054_vm10, %v1449_v2 }
 0x808   : > { %v1498_v5 = vpop.f32.mrf.mxu3 }
 0x809   : > { %v1499_v6 = vadd.f32 %v1996_v3, %v1498_v5 }
 0x80b   : > { %v1503_v7 = vadd.f32 %v1499_v6, %v1391_v35 }
 0x80d   : > { %v1507_v9 = vsel %vm938_vm8, %v1503_v7, 0.0 }
 0x80e   : > { %1508 = vadd.xlane.f32.xlu2 %v1507_v9 }
 0x810   : > { %v1500_v10 = vpop.f32.mrf.mxu3 }
 0x811   : > { %v1501_v11 = vadd.f32 %v1996_v3, %v1500_v10 }
 0x813   : > { %v1504_v12 = vadd.f32 %v1501_v11, %v1392_v36  ;;  %v1997_v36 = vld [vmem:[%s838_s5] ss:$0 sm:$0xff]  ;;  %s2570_s5 = sld [smem:[#allocation18_spill]] (!%p1903_p5) }
 0x815   : > { %v1510_v13 = vsel %vm938_vm8, %v1504_v12, 0.0 }
 0x816   : > { %1511 = vadd.xlane.f32.xlu1 %v1510_v13 }
 0x881   : > { %v1509_v14 = vpop.xlane.xlu2 %1508 }
 0x882   : > { %v1513_v15 = vmul.f32 %v1509_v14, %v2421_v62 }
 0x884   : > { %v1515_v16 = vsub.f32 %v1503_v7, %v1513_v15 }
 0x886   : > { %v1517_v4 = vmul.f32 %v1515_v16, %v1515_v16 }
 0x888   : > { %v1519_v17 = vsel %vm938_vm8, %v1517_v4, 0.0 }
 0x889   : > { %v1512_v18 = vpop.xlane.xlu1 %1511  ;;  %1520 = vadd.xlane.f32.xlu0 %v1519_v17 }
 0x88a   : > { %v1514_v19 = vmul.f32 %v1512_v18, %v2421_v62 }
 0x88c   : > { %v1516_v20 = vsub.f32 %v1504_v12, %v1514_v19 }
 0x88e   : > { %v1518_v21 = vmul.f32 %v1516_v20, %v1516_v20 }
 0x890   : > { %v1522_v22 = vsel %vm938_vm8, %v1518_v21, 0.0 }
 0x891   : > { %1523 = vadd.xlane.f32.xlu2 %v1522_v22 }
 0x8fc   : > { %v1521_v8 = vpop.xlane.xlu0 %1520 }
 0x8fd   : > { %v1525_v23 = vmul.f32 %v1521_v8, %v2421_v62 }
 0x8ff   : > { %v1527_v24 = vadd.f32 1e-12, %v1525_v23 }
 0x901   : > { %2041 = vrsqrt.f32 %v1527_v24  ;;  %vm1535_vm4 = vweird.f32 %v1527_v24 }
 0x904   : > { %v1524_v25 = vpop.xlane.xlu2 %1523 }
 0x905   : > { %v1526_v26 = vmul.f32 %v1524_v25, %v2421_v62 }
 0x907   : > { %v2042_v27 = vpop.eup %2041  ;;  %v1528_v28 = vadd.f32 1e-12, %v1526_v26 }
 0x908   : > { %v1530_v29 = vmul.f32 %v2042_v27, %v1527_v24  ;;  %vm1536_vm3 = vweird.f32 %v2042_v27 }
 0x909   : > { %2043 = vrsqrt.f32 %v1528_v28  ;;  %vm1537_vm5 = vmor %vm1535_vm4, %vm1536_vm3  ;;  %vm1545_vm7 = vweird.f32 %v1528_v28 }
 0x90a   : > { %v1531_v30 = vmul.f32 %v2042_v27, %v1530_v29 }
 0x90c   : > { %v1532_v31 = vmul.f32 0.5, %v1531_v30 }
 0x90e   : > { %v1533_v32 = vsub.f32 1.5, %v1532_v31 }
 0x90f   : > { %v2044_v33 = vpop.eup %2043 }
 0x910   : > { %v1534_v34 = vmul.f32 %v2042_v27, %v1533_v32  ;;  %v1540_v35 = vmul.f32 %v2044_v33, %v1528_v28  ;;  %vm1546_vm6 = vweird.f32 %v2044_v33 }
 0x911   : > { %vm1547_vm9 = vmor %vm1545_vm7, %vm1546_vm6 }
 0x912   : > { %v1538_v37 = vsel %vm1537_vm5, %v2042_v27, %v1534_v34  ;;  %v1541_v38 = vmul.f32 %v2044_v33, %v1540_v35 }
 0x913   : > { %v1549_v40 = vmul.f32 %v1538_v37, %v1515_v16 }
 0x914   : > { %v1542_v41 = vmul.f32 0.5, %v1541_v38 }
 0x915   : > { %v1554_v42 = vmul.f32 %v1997_v36, %v1549_v40 }
 0x916   : > { %v1543_v43 = vsub.f32 1.5, %v1542_v41 }
 0x917   : > { %v1559_v44 = vadd.f32 %v1998_v39, %v1554_v42 }
 0x918   : > { %v1544_v45 = vmul.f32 %v2044_v33, %v1543_v43 }
 0x919   : > { %1561 = vst.msk [vmem:[#allocation2] sm:$0xff] %vm938_vm8, %v1559_v44 }
 0x91a   : > { %v1548_v46 = vsel %vm1547_vm9, %v2044_v33, %v1544_v45 }
 0x91b   : > { %v1550_v47 = vmul.f32 %v1548_v46, %v1516_v20 }
 0x91d   : > { %v1555_v48 = vmul.f32 %v1997_v36, %v1550_v47  ;;  %1566 = sbr.rel (%p1903_p5) target bundleno = 2899 (0xb53), region = 116 }
 0x91f   : > { %v1560_v49 = vadd.f32 %v1998_v39, %v1555_v48 }
 0x921   : > { %1562 = vst.msk [vmem:[#allocation2 + $0x8] sm:$0xff] %vm938_vm8, %v1560_v49 }
 0x922   : > { %v1939_v50 = vld [vmem:[%s2529_s16 + $0x8] sm:$0xff]  ;;  %v1938_v53 = vld [vmem:[%s2529_s16] sm:$0xff]  ;;  %v1567_v54 = vpack.c.bf16 %v1559_v44, %v1559_v44  ;;  %vm1615_vm10 = vcmask 254976  }
 0x923   : > { %1597 = vmatpush.bf16.msra.mxu0 %v1939_v50  ;;  %v2045_v55 = vld [vmem:[%s2566_s30] ss:$0 sm:$0xff]  ;;  %v1941_v11 = vld [vmem:[%s2567_s1 + $0x8] sm:$0xff] }
 0x924   : > { %1676 = vmatpush.bf16.msra.mxu1 %v1941_v11  ;;  %v1940_v12 = vld [vmem:[%s2567_s1] sm:$0xff] }
 0x925   : > { %v2046_v21 = vld [vmem:[%s2568_s4] ss:$0 sm:$0xff] }
 0x926   : > { %v2048_v26 = vld [vmem:[%s2570_s5] ss:$0 sm:$0xff] }
 0x927   : > { %1598 = vmatpush.bf16.msra.mxu0 %v1938_v53 }
 0x928   : > { %1677 = vmatpush.bf16.msra.mxu1 %v1940_v12 }
 0x92a   : > { %1912 = vmatmul.msk.bf16.vlgmr.msra.gmra.mxu0 %vm938_vm8, %v1567_v54 }
 0x9a7   : > { %v1600_v56 = vpop.f32.mrf.mxu0 }
 0x9a8   : > { %v1601_v57 = vadd.f32 %v2045_v55, %v1600_v56 }
 0x9aa   : > { %v1605_v58 = vmul.f32 0.044715, %v1601_v57  ;;  %v1604_v52 = vmul.f32 0.5, %v1601_v57 }
 0x9ac   : > { %v1606_v59 = vmul.f32 %v1605_v58, %v1601_v57 }
 0x9ae   : > { %v1607_v61 = vmul.f32 %v1606_v59, %v1601_v57 }
 0x9af   : > { %v1602_v51 = vpop.f32.mrf.mxu0 }
 0x9b0   : > { %v1608_v63 = vadd.f32 %v1607_v61, %v1601_v57 }
 0x9b2   : > { %v1609_v0 = vmul.f32 0.7978846, %v1608_v63 }
 0x9b4   : > { %2049 = vtanh.f32 %v1609_v0 }
 0x9ba   : > { %v2050_v60 = vpop.eup %2049 }
 0x9bb   : > { %v1611_v1 = vadd.f32 1.0, %v2050_v60 }
 0x9bd   : > { %v1612_v2 = vmul.f32 %v1611_v1, %v1604_v52 }
 0x9bf   : > { %v1616_v3 = vsel %vm1615_vm10, %v1612_v2, 0.0 }
 0x9c0   : > { %1617 = vadd.xlane.f32.xlu0 %v1616_v3 }
 0xa33   : > { %v1618_v5 = vpop.xlane.xlu0 %1617 }
 0xa34   : > { %v1619_v6 = vmul.f32 %v1618_v5, %v2421_v62 }
 0xa36   : > { %v1620_v7 = vsub.f32 %v1612_v2, %v1619_v6 }
 0xa38   : > { %v1621_v9 = vmul.f32 %v1620_v7, %v1620_v7 }
 0xa3a   : > { %v1622_v10 = vsel %vm1615_vm10, %v1621_v9, 0.0 }
 0xa3b   : > { %1623 = vadd.xlane.f32.xlu0 %v1622_v10 }
 0xaae   : > { %v1624_v13 = vpop.xlane.xlu0 %1623 }
 0xaaf   : > { %v1625_v14 = vmul.f32 %v1624_v13, %v2421_v62  ;;  %v2047_v62 = vld [vmem:[%s2569_s0] ss:$0 sm:$0xff] }
 0xab1   : > { %v1626_v15 = vadd.f32 1e-12, %v1625_v14 }
 0xab3   : > { %2051 = vrsqrt.f32 %v1626_v15  ;;  %vm1633_vm12 = vweird.f32 %v1626_v15 }
 0xab9   : > { %v2052_v16 = vpop.eup %2051 }
 0xaba   : > { %v1628_v4 = vmul.f32 %v2052_v16, %v1626_v15  ;;  %vm1634_vm11 = vweird.f32 %v2052_v16 }
 0xabb   : > { %vm1635_vm13 = vmor %vm1633_vm12, %vm1634_vm11 }
 0xabc   : > { %v1629_v17 = vmul.f32 %v2052_v16, %v1628_v4 }
 0xabe   : > { %v1630_v18 = vmul.f32 0.5, %v1629_v17 }
 0xac0   : > { %v1631_v19 = vsub.f32 1.5, %v1630_v18 }
 0xac2   : > { %v1632_v20 = vmul.f32 %v2052_v16, %v1631_v19 }
 0xac4   : > { %v1636_v22 = vsel %vm1635_vm13, %v2052_v16, %v1632_v20 }
 0xac5   : > { %v1637_v8 = vmul.f32 %v1636_v22, %v1620_v7 }
 0xac7   : > { %v1641_v23 = vmul.f32 %v2046_v21, %v1637_v8 }
 0xac9   : > { %v1645_v24 = vadd.f32 %v2047_v62, %v1641_v23 }
 0xacb   : > { %v1646_v25 = vpack.c.bf16 %v1645_v24, %v1645_v24 }
 0xacd   : > { %1921 = vmatmul.msk.bf16.vlgmr.msra.gmra.mxu1 %vm938_vm8, %v1646_v25 }
 0xb4a   : > { %v1679_v27 = vpop.f32.mrf.mxu1 }
 0xb4b   : > { %v1680_v28 = vadd.f32 %v2048_v26, %v1679_v27 }
 0xb4d   : > { %1683 = vst [vmem:[#allocation3] sm:$0x3] %v1680_v28 }
 0xb52   : > { %v1681_v29 = vpop.f32.mrf.mxu1 }
 0xb53 PF: > { %p1950_p6 = scmp.eq.s32.totalorder %s2222_s28, 1  ;;  %s2100_s18 = smov [#allocation3]  }
 0xb54   : > { %s1690_s6 = sshll.u32 %s2100_s18, 4  ;;  %s2571_s24 = sld [smem:[#allocation19_spill]]  ;;  %s1691_s6 = int_to_ptr.vmem [resolvable:$true] %s1690_s6 }
 0xb5a   : > { %s1692_s2 = sshll.u32 %s2571_s24, 4  ;;  %s1693_s2 = int_to_ptr.hbm [resolvable:$true] %s1692_s2 }
 0xb5b   : > { %1947 = dma.vmem_to_hbm [thread:$0]  (%p1950_p6), %s1691_s6, 32, %s1693_s2, [#allocation4]  }
 0xb5c   : > { %2086 = dma.done.wait (%p1950_p6), [#allocation4], 32  }
 0xb5d   : > { %2088 = vsyncadd (%p1950_p6), [#allocation4], 4294967264 }
 0xb5e PF: > { %s2572_s22 = sld [smem:[#allocation6_spill]] }
 0xb64   : > { %s33_s3 = sadd.s32 1, %s2572_s22  }
 0xb65   : > { %p30_p7 = scmp.ge.s32.totalorder %s33_s3, 4  }
 0xb67   :  { %32 = sbr.rel (!%p30_p7) target bundleno = 15 (0xf), region = 179 }
 0xb6c   :  { %1706 = vsyncpa [#allocation4], 1 }
 0xb6d   :  { %1708 = vsyncpa [#allocation4 + $0x1], 1 }

</bundles_post_ra>
